<compile_context>
chip_gen: v5e
topology: v5e:2x2
jax: 0.10.0
libtpu: 0.0.40
codegen_flags: <defaults>
</compile_context>

<pallas_src>
import jax
import jax.numpy as jnp
from jax import lax
from jax.experimental import pallas as pl
from jax.experimental.pallas import tpu as pltpu

C_IN, C_OUT, KH, KW = 3, 3, 3, 3


def _make_kernel(H, W, padl):
    P = H * W

    def kernel(x_ref, w_ref, mask_ref, out_ref, xp_ref):
        # x_ref:    (nb, C_IN, P)            VMEM
        # w_ref:    (C_OUT*C_IN*KH*KW,)      SMEM scalars
        # mask_ref: (2, P)                   VMEM  [0]: valid for dw=-1, [1]: dw=+1
        # out_ref:  (nb, C_OUT, P)           VMEM (lane-dense output)
        # xp_ref:   (nb, C_IN, P + 2*padl)   VMEM scratch (zero-padded flat input)
        nb = x_ref.shape[0]

        # Hoist all weight scalar reads above the MAC loops (frees scalar slots).
        n_w = C_OUT * C_IN * KH * KW
        wv = [w_ref[i] for i in range(n_w)]

        # Build the zero-padded, flattened input in VMEM (no HBM pad pass).
        xp_ref[...] = jnp.zeros_like(xp_ref)
        xp_ref[:, :, padl:padl + P] = x_ref[...].astype(jnp.float32)
        xp = xp_ref[...]                                 # (nb, C_IN, P + 2*padl)

        m_left = mask_ref[0:1, :]                        # (1, P): w-1 >= 0
        m_right = mask_ref[1:2, :]                       # (1, P): w+1 <  W

        acc = [jnp.zeros((nb, P), jnp.float32) for _ in range(C_OUT)]
        for ci in range(C_IN):
            for kh in range(KH):
                dh = kh - 1
                for kw in range(KW):
                    dw = kw - 1
                    base = padl + dh * W + dw
                    xs = xp[:, ci, base:base + P]        # (nb, P), lane-dense shift
                    if dw == -1:
                        xs = xs * m_left
                    elif dw == 1:
                        xs = xs * m_right
                    for co in range(C_OUT):
                        widx = ((co * C_IN + ci) * KH + kh) * KW + kw
                        acc[co] = acc[co] + wv[widx] * xs

        for co in range(C_OUT):
            out_ref[:, co, :] = acc[co].astype(out_ref.dtype)

    return kernel


def client_net_forward(x, w):
    """x: (N, 3, H, W), w: (3, 3, 3, 3) -> (N, 3*H*W)."""
    N, C, H, W = x.shape
    assert C == C_IN
    P = H * W

    x_flat = x.reshape(N, C_IN, P)                       # free reshape (contiguous)
    w_flat = w.reshape(-1).astype(jnp.float32)

    # Left/right pad of the flattened spatial axis, rounded up to a lane tile so
    # the in-kernel scratch stores stay 128-aligned (only needs >= W+1).
    padl = ((W + 1 + 127) // 128) * 128

    # Column-validity masks for dw = -1 / +1 (kill cross-row wrap of the
    # flattened shift); row validity is handled by the zero padding itself.
    col = jnp.arange(P, dtype=jnp.int32) % W
    masks = jnp.stack([(col >= 1), (col <= W - 2)], axis=0).astype(jnp.float32)

    # Batch tiling: two big blocks when possible (feeds both TCs on v7x),
    # otherwise a single block holding the whole batch.
    if N >= 2 and N % 2 == 0:
        grid_n, nb = 2, N // 2
    else:
        grid_n, nb = 1, N

    kernel = _make_kernel(H, W, padl)
    conv_out = pl.pallas_call(
        kernel,
        out_shape=jax.ShapeDtypeStruct((N, C_OUT, P), x.dtype),
        grid=(grid_n,),
        in_specs=[
            pl.BlockSpec((nb, C_IN, P), lambda n: (n, 0, 0)),
            pl.BlockSpec(memory_space=pltpu.SMEM),       # whole weight vector
            pl.BlockSpec((2, P), lambda n: (0, 0)),      # column masks (resident)
        ],
        out_specs=pl.BlockSpec((nb, C_OUT, P), lambda n: (n, 0, 0)),
        scratch_shapes=[pltpu.VMEM((nb, C_IN, P + 2 * padl), jnp.float32)],
        compiler_params=pltpu.CompilerParams(dimension_semantics=("parallel",)),
    )(x_flat, w_flat, masks)

    # torch.flatten(x, 1): (N, C_OUT, H*W) -> (N, C_OUT*H*W) is a no-op reshape.
    return conv_out.reshape(N, -1)


def _reference(x, w):
    out = lax.conv_general_dilated(
        x, w, window_strides=(1, 1), padding=((1, 1), (1, 1)),
        dimension_numbers=("NCHW", "OIHW", "NCHW"))
    return out.reshape(x.shape[0], -1)


if __name__ == "__main__":
    key = jax.random.PRNGKey(0)
    kx, kw_key = jax.random.split(key)
    N, H, W = 2, 16, 16
    x = jax.random.normal(kx, (N, C_IN, H, W), dtype=jnp.float32)
    # deterministic Conv2d weight (out=3, in=3, 3, 3), no bias
    w = jax.random.normal(kw_key, (C_OUT, C_IN, KH, KW), dtype=jnp.float32) * 0.1

    out = jax.block_until_ready(client_net_forward(x, w))

    ref = _reference(x, w)
    assert out.shape == (N, C_OUT * H * W), out.shape
    assert jnp.allclose(out, ref, atol=1e-5, rtol=1e-5), "mismatch vs reference conv"
    print("KERNEL_OK")
</pallas_src>

<mosaic_0001>
module attributes {stable_mosaic.version = 11 : i64} {
  func.func @kernel(%arg0: i32, %arg1: memref<1x3x256xf32, #tpu.memory_space<vmem>>, %arg2: memref<81xf32, #tpu.memory_space<smem>>, %arg3: memref<2x256xf32, #tpu.memory_space<vmem>>, %arg4: memref<1x3x256xf32, #tpu.memory_space<vmem>>, %arg5: memref<1x3x512xf32, #tpu.memory_space<vmem>>) attributes {dimension_semantics = [#tpu.dimension_semantics<parallel>], iteration_bounds = array<i64: 2>, scalar_prefetch = 0 : i64, scratch_operands = 1 : i64, tpu.core_type = #tpu.core_type<tc>, window_params = [{transform_indices = @transform_0, window_bounds = array<i64: 1, 3, 256>}, {transform_indices = @transform_1, window_bounds = array<i64: 81>}, {pipeline_mode = #tpu.pipeline_mode<synchronous>, transform_indices = @transform_2, window_bounds = array<i64: 2, 256>}, {transform_indices = @transform_3, window_bounds = array<i64: 1, 3, 256>}]} {
    %c0 = arith.constant 0 : index
    %0 = memref.load %arg2[%c0] : memref<81xf32, #tpu.memory_space<smem>>
    %c1 = arith.constant 1 : index
    %1 = memref.load %arg2[%c1] : memref<81xf32, #tpu.memory_space<smem>>
    %c2 = arith.constant 2 : index
    %2 = memref.load %arg2[%c2] : memref<81xf32, #tpu.memory_space<smem>>
    %c3 = arith.constant 3 : index
    %3 = memref.load %arg2[%c3] : memref<81xf32, #tpu.memory_space<smem>>
    %c4 = arith.constant 4 : index
    %4 = memref.load %arg2[%c4] : memref<81xf32, #tpu.memory_space<smem>>
    %c5 = arith.constant 5 : index
    %5 = memref.load %arg2[%c5] : memref<81xf32, #tpu.memory_space<smem>>
    %c6 = arith.constant 6 : index
    %6 = memref.load %arg2[%c6] : memref<81xf32, #tpu.memory_space<smem>>
    %c7 = arith.constant 7 : index
    %7 = memref.load %arg2[%c7] : memref<81xf32, #tpu.memory_space<smem>>
    %c8 = arith.constant 8 : index
    %8 = memref.load %arg2[%c8] : memref<81xf32, #tpu.memory_space<smem>>
    %c9 = arith.constant 9 : index
    %9 = memref.load %arg2[%c9] : memref<81xf32, #tpu.memory_space<smem>>
    %c10 = arith.constant 10 : index
    %10 = memref.load %arg2[%c10] : memref<81xf32, #tpu.memory_space<smem>>
    %c11 = arith.constant 11 : index
    %11 = memref.load %arg2[%c11] : memref<81xf32, #tpu.memory_space<smem>>
    %c12 = arith.constant 12 : index
    %12 = memref.load %arg2[%c12] : memref<81xf32, #tpu.memory_space<smem>>
    %c13 = arith.constant 13 : index
    %13 = memref.load %arg2[%c13] : memref<81xf32, #tpu.memory_space<smem>>
    %c14 = arith.constant 14 : index
    %14 = memref.load %arg2[%c14] : memref<81xf32, #tpu.memory_space<smem>>
    %c15 = arith.constant 15 : index
    %15 = memref.load %arg2[%c15] : memref<81xf32, #tpu.memory_space<smem>>
    %c16 = arith.constant 16 : index
    %16 = memref.load %arg2[%c16] : memref<81xf32, #tpu.memory_space<smem>>
    %c17 = arith.constant 17 : index
    %17 = memref.load %arg2[%c17] : memref<81xf32, #tpu.memory_space<smem>>
    %c18 = arith.constant 18 : index
    %18 = memref.load %arg2[%c18] : memref<81xf32, #tpu.memory_space<smem>>
    %c19 = arith.constant 19 : index
    %19 = memref.load %arg2[%c19] : memref<81xf32, #tpu.memory_space<smem>>
    %c20 = arith.constant 20 : index
    %20 = memref.load %arg2[%c20] : memref<81xf32, #tpu.memory_space<smem>>
    %c21 = arith.constant 21 : index
    %21 = memref.load %arg2[%c21] : memref<81xf32, #tpu.memory_space<smem>>
    %c22 = arith.constant 22 : index
    %22 = memref.load %arg2[%c22] : memref<81xf32, #tpu.memory_space<smem>>
    %c23 = arith.constant 23 : index
    %23 = memref.load %arg2[%c23] : memref<81xf32, #tpu.memory_space<smem>>
    %c24 = arith.constant 24 : index
    %24 = memref.load %arg2[%c24] : memref<81xf32, #tpu.memory_space<smem>>
    %c25 = arith.constant 25 : index
    %25 = memref.load %arg2[%c25] : memref<81xf32, #tpu.memory_space<smem>>
    %c26 = arith.constant 26 : index
    %26 = memref.load %arg2[%c26] : memref<81xf32, #tpu.memory_space<smem>>
    %c27 = arith.constant 27 : index
    %27 = memref.load %arg2[%c27] : memref<81xf32, #tpu.memory_space<smem>>
    %c28 = arith.constant 28 : index
    %28 = memref.load %arg2[%c28] : memref<81xf32, #tpu.memory_space<smem>>
    %c29 = arith.constant 29 : index
    %29 = memref.load %arg2[%c29] : memref<81xf32, #tpu.memory_space<smem>>
    %c30 = arith.constant 30 : index
    %30 = memref.load %arg2[%c30] : memref<81xf32, #tpu.memory_space<smem>>
    %c31 = arith.constant 31 : index
    %31 = memref.load %arg2[%c31] : memref<81xf32, #tpu.memory_space<smem>>
    %c32 = arith.constant 32 : index
    %32 = memref.load %arg2[%c32] : memref<81xf32, #tpu.memory_space<smem>>
    %c33 = arith.constant 33 : index
    %33 = memref.load %arg2[%c33] : memref<81xf32, #tpu.memory_space<smem>>
    %c34 = arith.constant 34 : index
    %34 = memref.load %arg2[%c34] : memref<81xf32, #tpu.memory_space<smem>>
    %c35 = arith.constant 35 : index
    %35 = memref.load %arg2[%c35] : memref<81xf32, #tpu.memory_space<smem>>
    %c36 = arith.constant 36 : index
    %36 = memref.load %arg2[%c36] : memref<81xf32, #tpu.memory_space<smem>>
    %c37 = arith.constant 37 : index
    %37 = memref.load %arg2[%c37] : memref<81xf32, #tpu.memory_space<smem>>
    %c38 = arith.constant 38 : index
    %38 = memref.load %arg2[%c38] : memref<81xf32, #tpu.memory_space<smem>>
    %c39 = arith.constant 39 : index
    %39 = memref.load %arg2[%c39] : memref<81xf32, #tpu.memory_space<smem>>
    %c40 = arith.constant 40 : index
    %40 = memref.load %arg2[%c40] : memref<81xf32, #tpu.memory_space<smem>>
    %c41 = arith.constant 41 : index
    %41 = memref.load %arg2[%c41] : memref<81xf32, #tpu.memory_space<smem>>
    %c42 = arith.constant 42 : index
    %42 = memref.load %arg2[%c42] : memref<81xf32, #tpu.memory_space<smem>>
    %c43 = arith.constant 43 : index
    %43 = memref.load %arg2[%c43] : memref<81xf32, #tpu.memory_space<smem>>
    %c44 = arith.constant 44 : index
    %44 = memref.load %arg2[%c44] : memref<81xf32, #tpu.memory_space<smem>>
    %c45 = arith.constant 45 : index
    %45 = memref.load %arg2[%c45] : memref<81xf32, #tpu.memory_space<smem>>
    %c46 = arith.constant 46 : index
    %46 = memref.load %arg2[%c46] : memref<81xf32, #tpu.memory_space<smem>>
    %c47 = arith.constant 47 : index
    %47 = memref.load %arg2[%c47] : memref<81xf32, #tpu.memory_space<smem>>
    %c48 = arith.constant 48 : index
    %48 = memref.load %arg2[%c48] : memref<81xf32, #tpu.memory_space<smem>>
    %c49 = arith.constant 49 : index
    %49 = memref.load %arg2[%c49] : memref<81xf32, #tpu.memory_space<smem>>
    %c50 = arith.constant 50 : index
    %50 = memref.load %arg2[%c50] : memref<81xf32, #tpu.memory_space<smem>>
    %c51 = arith.constant 51 : index
    %51 = memref.load %arg2[%c51] : memref<81xf32, #tpu.memory_space<smem>>
    %c52 = arith.constant 52 : index
    %52 = memref.load %arg2[%c52] : memref<81xf32, #tpu.memory_space<smem>>
    %c53 = arith.constant 53 : index
    %53 = memref.load %arg2[%c53] : memref<81xf32, #tpu.memory_space<smem>>
    %c54 = arith.constant 54 : index
    %54 = memref.load %arg2[%c54] : memref<81xf32, #tpu.memory_space<smem>>
    %c55 = arith.constant 55 : index
    %55 = memref.load %arg2[%c55] : memref<81xf32, #tpu.memory_space<smem>>
    %c56 = arith.constant 56 : index
    %56 = memref.load %arg2[%c56] : memref<81xf32, #tpu.memory_space<smem>>
    %c57 = arith.constant 57 : index
    %57 = memref.load %arg2[%c57] : memref<81xf32, #tpu.memory_space<smem>>
    %c58 = arith.constant 58 : index
    %58 = memref.load %arg2[%c58] : memref<81xf32, #tpu.memory_space<smem>>
    %c59 = arith.constant 59 : index
    %59 = memref.load %arg2[%c59] : memref<81xf32, #tpu.memory_space<smem>>
    %c60 = arith.constant 60 : index
    %60 = memref.load %arg2[%c60] : memref<81xf32, #tpu.memory_space<smem>>
    %c61 = arith.constant 61 : index
    %61 = memref.load %arg2[%c61] : memref<81xf32, #tpu.memory_space<smem>>
    %c62 = arith.constant 62 : index
    %62 = memref.load %arg2[%c62] : memref<81xf32, #tpu.memory_space<smem>>
    %c63 = arith.constant 63 : index
    %63 = memref.load %arg2[%c63] : memref<81xf32, #tpu.memory_space<smem>>
    %c64 = arith.constant 64 : index
    %64 = memref.load %arg2[%c64] : memref<81xf32, #tpu.memory_space<smem>>
    %c65 = arith.constant 65 : index
    %65 = memref.load %arg2[%c65] : memref<81xf32, #tpu.memory_space<smem>>
    %c66 = arith.constant 66 : index
    %66 = memref.load %arg2[%c66] : memref<81xf32, #tpu.memory_space<smem>>
    %c67 = arith.constant 67 : index
    %67 = memref.load %arg2[%c67] : memref<81xf32, #tpu.memory_space<smem>>
    %c68 = arith.constant 68 : index
    %68 = memref.load %arg2[%c68] : memref<81xf32, #tpu.memory_space<smem>>
    %c69 = arith.constant 69 : index
    %69 = memref.load %arg2[%c69] : memref<81xf32, #tpu.memory_space<smem>>
    %c70 = arith.constant 70 : index
    %70 = memref.load %arg2[%c70] : memref<81xf32, #tpu.memory_space<smem>>
    %c71 = arith.constant 71 : index
    %71 = memref.load %arg2[%c71] : memref<81xf32, #tpu.memory_space<smem>>
    %c72 = arith.constant 72 : index
    %72 = memref.load %arg2[%c72] : memref<81xf32, #tpu.memory_space<smem>>
    %c73 = arith.constant 73 : index
    %73 = memref.load %arg2[%c73] : memref<81xf32, #tpu.memory_space<smem>>
    %c74 = arith.constant 74 : index
    %74 = memref.load %arg2[%c74] : memref<81xf32, #tpu.memory_space<smem>>
    %c75 = arith.constant 75 : index
    %75 = memref.load %arg2[%c75] : memref<81xf32, #tpu.memory_space<smem>>
    %c76 = arith.constant 76 : index
    %76 = memref.load %arg2[%c76] : memref<81xf32, #tpu.memory_space<smem>>
    %c77 = arith.constant 77 : index
    %77 = memref.load %arg2[%c77] : memref<81xf32, #tpu.memory_space<smem>>
    %c78 = arith.constant 78 : index
    %78 = memref.load %arg2[%c78] : memref<81xf32, #tpu.memory_space<smem>>
    %c79 = arith.constant 79 : index
    %79 = memref.load %arg2[%c79] : memref<81xf32, #tpu.memory_space<smem>>
    %c80 = arith.constant 80 : index
    %80 = memref.load %arg2[%c80] : memref<81xf32, #tpu.memory_space<smem>>
    %cst = arith.constant 0.000000e+00 : f32
    %81 = vector.broadcast %cst : f32 to vector<1x3x512xf32>
    %c0_0 = arith.constant 0 : index
    %c0_1 = arith.constant 0 : index
    %c0_2 = arith.constant 0 : index
    %82 = vector.load %arg5[%c0_0, %c0_1, %c0_2] : memref<1x3x512xf32, #tpu.memory_space<vmem>>, vector<1x3x512xf32>
    tpu.vector_store %arg5[%c0_0, %c0_1, %c0_2], %81 {strides = array<i32>} : memref<1x3x512xf32, #tpu.memory_space<vmem>>, vector<1x3x512xf32>,
    %c0_3 = arith.constant 0 : index
    %c0_4 = arith.constant 0 : index
    %c0_5 = arith.constant 0 : index
    %83 = vector.load %arg1[%c0_3, %c0_4, %c0_5] : memref<1x3x256xf32, #tpu.memory_space<vmem>>, vector<1x3x256xf32>
    %c0_6 = arith.constant 0 : index
    %c0_7 = arith.constant 0 : index
    %c128 = arith.constant 128 : index
    %84 = vector.load %arg5[%c0_6, %c0_7, %c128] : memref<1x3x512xf32, #tpu.memory_space<vmem>>, vector<1x3x256xf32>
    tpu.vector_store %arg5[%c0_6, %c0_7, %c128], %83 {strides = array<i32>} : memref<1x3x512xf32, #tpu.memory_space<vmem>>, vector<1x3x256xf32>,
    %c0_8 = arith.constant 0 : index
    %c0_9 = arith.constant 0 : index
    %c0_10 = arith.constant 0 : index
    %85 = vector.load %arg5[%c0_8, %c0_9, %c0_10] : memref<1x3x512xf32, #tpu.memory_space<vmem>>, vector<1x3x512xf32>
    %c0_11 = arith.constant 0 : index
    %c0_12 = arith.constant 0 : index
    %86 = vector.load %arg3[%c0_11, %c0_12] : memref<2x256xf32, #tpu.memory_space<vmem>>, vector<1x256xf32>
    %c1_13 = arith.constant 1 : index
    %c0_14 = arith.constant 0 : index
    %87 = vector.load %arg3[%c1_13, %c0_14] : memref<2x256xf32, #tpu.memory_space<vmem>>, vector<1x256xf32>
    %cst_15 = arith.constant 0.000000e+00 : f32
    %88 = vector.broadcast %cst_15 : f32 to vector<1x256xf32>
    %cst_16 = arith.constant 0.000000e+00 : f32
    %89 = vector.broadcast %cst_16 : f32 to vector<1x256xf32>
    %cst_17 = arith.constant 0.000000e+00 : f32
    %90 = vector.broadcast %cst_17 : f32 to vector<1x256xf32>
    %91 = vector.extract_strided_slice %85 {offsets = [0, 0, 111], sizes = [1, 1, 256], strides = [1, 1, 1]} : vector<1x3x512xf32> to vector<1x1x256xf32>
    %92 = vector.shape_cast %91 : vector<1x1x256xf32> to vector<1x256xf32>
    %93 = arith.mulf %92, %86 : vector<1x256xf32>
    %94 = vector.broadcast %0 : f32 to vector<1x256xf32>
    %95 = arith.mulf %94, %93 : vector<1x256xf32>
    %96 = arith.addf %88, %95 : vector<1x256xf32>
    %97 = vector.broadcast %27 : f32 to vector<1x256xf32>
    %98 = arith.mulf %97, %93 : vector<1x256xf32>
    %99 = arith.addf %89, %98 : vector<1x256xf32>
    %100 = vector.broadcast %54 : f32 to vector<1x256xf32>
    %101 = arith.mulf %100, %93 : vector<1x256xf32>
    %102 = arith.addf %90, %101 : vector<1x256xf32>
    %103 = vector.extract_strided_slice %85 {offsets = [0, 0, 112], sizes = [1, 1, 256], strides = [1, 1, 1]} : vector<1x3x512xf32> to vector<1x1x256xf32>
    %104 = vector.shape_cast %103 : vector<1x1x256xf32> to vector<1x256xf32>
    %105 = vector.broadcast %1 : f32 to vector<1x256xf32>
    %106 = arith.mulf %105, %104 : vector<1x256xf32>
    %107 = arith.addf %96, %106 : vector<1x256xf32>
    %108 = vector.broadcast %28 : f32 to vector<1x256xf32>
    %109 = arith.mulf %108, %104 : vector<1x256xf32>
    %110 = arith.addf %99, %109 : vector<1x256xf32>
    %111 = vector.broadcast %55 : f32 to vector<1x256xf32>
    %112 = arith.mulf %111, %104 : vector<1x256xf32>
    %113 = arith.addf %102, %112 : vector<1x256xf32>
    %114 = vector.extract_strided_slice %85 {offsets = [0, 0, 113], sizes = [1, 1, 256], strides = [1, 1, 1]} : vector<1x3x512xf32> to vector<1x1x256xf32>
    %115 = vector.shape_cast %114 : vector<1x1x256xf32> to vector<1x256xf32>
    %116 = arith.mulf %115, %87 : vector<1x256xf32>
    %117 = vector.broadcast %2 : f32 to vector<1x256xf32>
    %118 = arith.mulf %117, %116 : vector<1x256xf32>
    %119 = arith.addf %107, %118 : vector<1x256xf32>
    %120 = vector.broadcast %29 : f32 to vector<1x256xf32>
    %121 = arith.mulf %120, %116 : vector<1x256xf32>
    %122 = arith.addf %110, %121 : vector<1x256xf32>
    %123 = vector.broadcast %56 : f32 to vector<1x256xf32>
    %124 = arith.mulf %123, %116 : vector<1x256xf32>
    %125 = arith.addf %113, %124 : vector<1x256xf32>
    %126 = vector.extract_strided_slice %85 {offsets = [0, 0, 127], sizes = [1, 1, 256], strides = [1, 1, 1]} : vector<1x3x512xf32> to vector<1x1x256xf32>
    %127 = vector.shape_cast %126 : vector<1x1x256xf32> to vector<1x256xf32>
    %128 = arith.mulf %127, %86 : vector<1x256xf32>
    %129 = vector.broadcast %3 : f32 to vector<1x256xf32>
    %130 = arith.mulf %129, %128 : vector<1x256xf32>
    %131 = arith.addf %119, %130 : vector<1x256xf32>
    %132 = vector.broadcast %30 : f32 to vector<1x256xf32>
    %133 = arith.mulf %132, %128 : vector<1x256xf32>
    %134 = arith.addf %122, %133 : vector<1x256xf32>
    %135 = vector.broadcast %57 : f32 to vector<1x256xf32>
    %136 = arith.mulf %135, %128 : vector<1x256xf32>
    %137 = arith.addf %125, %136 : vector<1x256xf32>
    %138 = vector.extract_strided_slice %85 {offsets = [0, 0, 128], sizes = [1, 1, 256], strides = [1, 1, 1]} : vector<1x3x512xf32> to vector<1x1x256xf32>
    %139 = vector.shape_cast %138 : vector<1x1x256xf32> to vector<1x256xf32>
    %140 = vector.broadcast %4 : f32 to vector<1x256xf32>
    %141 = arith.mulf %140, %139 : vector<1x256xf32>
    %142 = arith.addf %131, %141 : vector<1x256xf32>
    %143 = vector.broadcast %31 : f32 to vector<1x256xf32>
    %144 = arith.mulf %143, %139 : vector<1x256xf32>
    %145 = arith.addf %134, %144 : vector<1x256xf32>
    %146 = vector.broadcast %58 : f32 to vector<1x256xf32>
    %147 = arith.mulf %146, %139 : vector<1x256xf32>
    %148 = arith.addf %137, %147 : vector<1x256xf32>
    %149 = vector.extract_strided_slice %85 {offsets = [0, 0, 129], sizes = [1, 1, 256], strides = [1, 1, 1]} : vector<1x3x512xf32> to vector<1x1x256xf32>
    %150 = vector.shape_cast %149 : vector<1x1x256xf32> to vector<1x256xf32>
    %151 = arith.mulf %150, %87 : vector<1x256xf32>
    %152 = vector.broadcast %5 : f32 to vector<1x256xf32>
    %153 = arith.mulf %152, %151 : vector<1x256xf32>
    %154 = arith.addf %142, %153 : vector<1x256xf32>
    %155 = vector.broadcast %32 : f32 to vector<1x256xf32>
    %156 = arith.mulf %155, %151 : vector<1x256xf32>
    %157 = arith.addf %145, %156 : vector<1x256xf32>
    %158 = vector.broadcast %59 : f32 to vector<1x256xf32>
    %159 = arith.mulf %158, %151 : vector<1x256xf32>
    %160 = arith.addf %148, %159 : vector<1x256xf32>
    %161 = vector.extract_strided_slice %85 {offsets = [0, 0, 143], sizes = [1, 1, 256], strides = [1, 1, 1]} : vector<1x3x512xf32> to vector<1x1x256xf32>
    %162 = vector.shape_cast %161 : vector<1x1x256xf32> to vector<1x256xf32>
    %163 = arith.mulf %162, %86 : vector<1x256xf32>
    %164 = vector.broadcast %6 : f32 to vector<1x256xf32>
    %165 = arith.mulf %164, %163 : vector<1x256xf32>
    %166 = arith.addf %154, %165 : vector<1x256xf32>
    %167 = vector.broadcast %33 : f32 to vector<1x256xf32>
    %168 = arith.mulf %167, %163 : vector<1x256xf32>
    %169 = arith.addf %157, %168 : vector<1x256xf32>
    %170 = vector.broadcast %60 : f32 to vector<1x256xf32>
    %171 = arith.mulf %170, %163 : vector<1x256xf32>
    %172 = arith.addf %160, %171 : vector<1x256xf32>
    %173 = vector.extract_strided_slice %85 {offsets = [0, 0, 144], sizes = [1, 1, 256], strides = [1, 1, 1]} : vector<1x3x512xf32> to vector<1x1x256xf32>
    %174 = vector.shape_cast %173 : vector<1x1x256xf32> to vector<1x256xf32>
    %175 = vector.broadcast %7 : f32 to vector<1x256xf32>
    %176 = arith.mulf %175, %174 : vector<1x256xf32>
    %177 = arith.addf %166, %176 : vector<1x256xf32>
    %178 = vector.broadcast %34 : f32 to vector<1x256xf32>
    %179 = arith.mulf %178, %174 : vector<1x256xf32>
    %180 = arith.addf %169, %179 : vector<1x256xf32>
    %181 = vector.broadcast %61 : f32 to vector<1x256xf32>
    %182 = arith.mulf %181, %174 : vector<1x256xf32>
    %183 = arith.addf %172, %182 : vector<1x256xf32>
    %184 = vector.extract_strided_slice %85 {offsets = [0, 0, 145], sizes = [1, 1, 256], strides = [1, 1, 1]} : vector<1x3x512xf32> to vector<1x1x256xf32>
    %185 = vector.shape_cast %184 : vector<1x1x256xf32> to vector<1x256xf32>
    %186 = arith.mulf %185, %87 : vector<1x256xf32>
    %187 = vector.broadcast %8 : f32 to vector<1x256xf32>
    %188 = arith.mulf %187, %186 : vector<1x256xf32>
    %189 = arith.addf %177, %188 : vector<1x256xf32>
    %190 = vector.broadcast %35 : f32 to vector<1x256xf32>
    %191 = arith.mulf %190, %186 : vector<1x256xf32>
    %192 = arith.addf %180, %191 : vector<1x256xf32>
    %193 = vector.broadcast %62 : f32 to vector<1x256xf32>
    %194 = arith.mulf %193, %186 : vector<1x256xf32>
    %195 = arith.addf %183, %194 : vector<1x256xf32>
    %196 = vector.extract_strided_slice %85 {offsets = [0, 1, 111], sizes = [1, 1, 256], strides = [1, 1, 1]} : vector<1x3x512xf32> to vector<1x1x256xf32>
    %197 = vector.shape_cast %196 : vector<1x1x256xf32> to vector<1x256xf32>
    %198 = arith.mulf %197, %86 : vector<1x256xf32>
    %199 = vector.broadcast %9 : f32 to vector<1x256xf32>
    %200 = arith.mulf %199, %198 : vector<1x256xf32>
    %201 = arith.addf %189, %200 : vector<1x256xf32>
    %202 = vector.broadcast %36 : f32 to vector<1x256xf32>
    %203 = arith.mulf %202, %198 : vector<1x256xf32>
    %204 = arith.addf %192, %203 : vector<1x256xf32>
    %205 = vector.broadcast %63 : f32 to vector<1x256xf32>
    %206 = arith.mulf %205, %198 : vector<1x256xf32>
    %207 = arith.addf %195, %206 : vector<1x256xf32>
    %208 = vector.extract_strided_slice %85 {offsets = [0, 1, 112], sizes = [1, 1, 256], strides = [1, 1, 1]} : vector<1x3x512xf32> to vector<1x1x256xf32>
    %209 = vector.shape_cast %208 : vector<1x1x256xf32> to vector<1x256xf32>
    %210 = vector.broadcast %10 : f32 to vector<1x256xf32>
    %211 = arith.mulf %210, %209 : vector<1x256xf32>
    %212 = arith.addf %201, %211 : vector<1x256xf32>
    %213 = vector.broadcast %37 : f32 to vector<1x256xf32>
    %214 = arith.mulf %213, %209 : vector<1x256xf32>
    %215 = arith.addf %204, %214 : vector<1x256xf32>
    %216 = vector.broadcast %64 : f32 to vector<1x256xf32>
    %217 = arith.mulf %216, %209 : vector<1x256xf32>
    %218 = arith.addf %207, %217 : vector<1x256xf32>
    %219 = vector.extract_strided_slice %85 {offsets = [0, 1, 113], sizes = [1, 1, 256], strides = [1, 1, 1]} : vector<1x3x512xf32> to vector<1x1x256xf32>
    %220 = vector.shape_cast %219 : vector<1x1x256xf32> to vector<1x256xf32>
    %221 = arith.mulf %220, %87 : vector<1x256xf32>
    %222 = vector.broadcast %11 : f32 to vector<1x256xf32>
    %223 = arith.mulf %222, %221 : vector<1x256xf32>
    %224 = arith.addf %212, %223 : vector<1x256xf32>
    %225 = vector.broadcast %38 : f32 to vector<1x256xf32>
    %226 = arith.mulf %225, %221 : vector<1x256xf32>
    %227 = arith.addf %215, %226 : vector<1x256xf32>
    %228 = vector.broadcast %65 : f32 to vector<1x256xf32>
    %229 = arith.mulf %228, %221 : vector<1x256xf32>
    %230 = arith.addf %218, %229 : vector<1x256xf32>
    %231 = vector.extract_strided_slice %85 {offsets = [0, 1, 127], sizes = [1, 1, 256], strides = [1, 1, 1]} : vector<1x3x512xf32> to vector<1x1x256xf32>
    %232 = vector.shape_cast %231 : vector<1x1x256xf32> to vector<1x256xf32>
    %233 = arith.mulf %232, %86 : vector<1x256xf32>
    %234 = vector.broadcast %12 : f32 to vector<1x256xf32>
    %235 = arith.mulf %234, %233 : vector<1x256xf32>
    %236 = arith.addf %224, %235 : vector<1x256xf32>
    %237 = vector.broadcast %39 : f32 to vector<1x256xf32>
    %238 = arith.mulf %237, %233 : vector<1x256xf32>
    %239 = arith.addf %227, %238 : vector<1x256xf32>
    %240 = vector.broadcast %66 : f32 to vector<1x256xf32>
    %241 = arith.mulf %240, %233 : vector<1x256xf32>
    %242 = arith.addf %230, %241 : vector<1x256xf32>
    %243 = vector.extract_strided_slice %85 {offsets = [0, 1, 128], sizes = [1, 1, 256], strides = [1, 1, 1]} : vector<1x3x512xf32> to vector<1x1x256xf32>
    %244 = vector.shape_cast %243 : vector<1x1x256xf32> to vector<1x256xf32>
    %245 = vector.broadcast %13 : f32 to vector<1x256xf32>
    %246 = arith.mulf %245, %244 : vector<1x256xf32>
    %247 = arith.addf %236, %246 : vector<1x256xf32>
    %248 = vector.broadcast %40 : f32 to vector<1x256xf32>
    %249 = arith.mulf %248, %244 : vector<1x256xf32>
    %250 = arith.addf %239, %249 : vector<1x256xf32>
    %251 = vector.broadcast %67 : f32 to vector<1x256xf32>
    %252 = arith.mulf %251, %244 : vector<1x256xf32>
    %253 = arith.addf %242, %252 : vector<1x256xf32>
    %254 = vector.extract_strided_slice %85 {offsets = [0, 1, 129], sizes = [1, 1, 256], strides = [1, 1, 1]} : vector<1x3x512xf32> to vector<1x1x256xf32>
    %255 = vector.shape_cast %254 : vector<1x1x256xf32> to vector<1x256xf32>
    %256 = arith.mulf %255, %87 : vector<1x256xf32>
    %257 = vector.broadcast %14 : f32 to vector<1x256xf32>
    %258 = arith.mulf %257, %256 : vector<1x256xf32>
    %259 = arith.addf %247, %258 : vector<1x256xf32>
    %260 = vector.broadcast %41 : f32 to vector<1x256xf32>
    %261 = arith.mulf %260, %256 : vector<1x256xf32>
    %262 = arith.addf %250, %261 : vector<1x256xf32>
    %263 = vector.broadcast %68 : f32 to vector<1x256xf32>
    %264 = arith.mulf %263, %256 : vector<1x256xf32>
    %265 = arith.addf %253, %264 : vector<1x256xf32>
    %266 = vector.extract_strided_slice %85 {offsets = [0, 1, 143], sizes = [1, 1, 256], strides = [1, 1, 1]} : vector<1x3x512xf32> to vector<1x1x256xf32>
    %267 = vector.shape_cast %266 : vector<1x1x256xf32> to vector<1x256xf32>
    %268 = arith.mulf %267, %86 : vector<1x256xf32>
    %269 = vector.broadcast %15 : f32 to vector<1x256xf32>
    %270 = arith.mulf %269, %268 : vector<1x256xf32>
    %271 = arith.addf %259, %270 : vector<1x256xf32>
    %272 = vector.broadcast %42 : f32 to vector<1x256xf32>
    %273 = arith.mulf %272, %268 : vector<1x256xf32>
    %274 = arith.addf %262, %273 : vector<1x256xf32>
    %275 = vector.broadcast %69 : f32 to vector<1x256xf32>
    %276 = arith.mulf %275, %268 : vector<1x256xf32>
    %277 = arith.addf %265, %276 : vector<1x256xf32>
    %278 = vector.extract_strided_slice %85 {offsets = [0, 1, 144], sizes = [1, 1, 256], strides = [1, 1, 1]} : vector<1x3x512xf32> to vector<1x1x256xf32>
    %279 = vector.shape_cast %278 : vector<1x1x256xf32> to vector<1x256xf32>
    %280 = vector.broadcast %16 : f32 to vector<1x256xf32>
    %281 = arith.mulf %280, %279 : vector<1x256xf32>
    %282 = arith.addf %271, %281 : vector<1x256xf32>
    %283 = vector.broadcast %43 : f32 to vector<1x256xf32>
    %284 = arith.mulf %283, %279 : vector<1x256xf32>
    %285 = arith.addf %274, %284 : vector<1x256xf32>
    %286 = vector.broadcast %70 : f32 to vector<1x256xf32>
    %287 = arith.mulf %286, %279 : vector<1x256xf32>
    %288 = arith.addf %277, %287 : vector<1x256xf32>
    %289 = vector.extract_strided_slice %85 {offsets = [0, 1, 145], sizes = [1, 1, 256], strides = [1, 1, 1]} : vector<1x3x512xf32> to vector<1x1x256xf32>
    %290 = vector.shape_cast %289 : vector<1x1x256xf32> to vector<1x256xf32>
    %291 = arith.mulf %290, %87 : vector<1x256xf32>
    %292 = vector.broadcast %17 : f32 to vector<1x256xf32>
    %293 = arith.mulf %292, %291 : vector<1x256xf32>
    %294 = arith.addf %282, %293 : vector<1x256xf32>
    %295 = vector.broadcast %44 : f32 to vector<1x256xf32>
    %296 = arith.mulf %295, %291 : vector<1x256xf32>
    %297 = arith.addf %285, %296 : vector<1x256xf32>
    %298 = vector.broadcast %71 : f32 to vector<1x256xf32>
    %299 = arith.mulf %298, %291 : vector<1x256xf32>
    %300 = arith.addf %288, %299 : vector<1x256xf32>
    %301 = vector.extract_strided_slice %85 {offsets = [0, 2, 111], sizes = [1, 1, 256], strides = [1, 1, 1]} : vector<1x3x512xf32> to vector<1x1x256xf32>
    %302 = vector.shape_cast %301 : vector<1x1x256xf32> to vector<1x256xf32>
    %303 = arith.mulf %302, %86 : vector<1x256xf32>
    %304 = vector.broadcast %18 : f32 to vector<1x256xf32>
    %305 = arith.mulf %304, %303 : vector<1x256xf32>
    %306 = arith.addf %294, %305 : vector<1x256xf32>
    %307 = vector.broadcast %45 : f32 to vector<1x256xf32>
    %308 = arith.mulf %307, %303 : vector<1x256xf32>
    %309 = arith.addf %297, %308 : vector<1x256xf32>
    %310 = vector.broadcast %72 : f32 to vector<1x256xf32>
    %311 = arith.mulf %310, %303 : vector<1x256xf32>
    %312 = arith.addf %300, %311 : vector<1x256xf32>
    %313 = vector.extract_strided_slice %85 {offsets = [0, 2, 112], sizes = [1, 1, 256], strides = [1, 1, 1]} : vector<1x3x512xf32> to vector<1x1x256xf32>
    %314 = vector.shape_cast %313 : vector<1x1x256xf32> to vector<1x256xf32>
    %315 = vector.broadcast %19 : f32 to vector<1x256xf32>
    %316 = arith.mulf %315, %314 : vector<1x256xf32>
    %317 = arith.addf %306, %316 : vector<1x256xf32>
    %318 = vector.broadcast %46 : f32 to vector<1x256xf32>
    %319 = arith.mulf %318, %314 : vector<1x256xf32>
    %320 = arith.addf %309, %319 : vector<1x256xf32>
    %321 = vector.broadcast %73 : f32 to vector<1x256xf32>
    %322 = arith.mulf %321, %314 : vector<1x256xf32>
    %323 = arith.addf %312, %322 : vector<1x256xf32>
    %324 = vector.extract_strided_slice %85 {offsets = [0, 2, 113], sizes = [1, 1, 256], strides = [1, 1, 1]} : vector<1x3x512xf32> to vector<1x1x256xf32>
    %325 = vector.shape_cast %324 : vector<1x1x256xf32> to vector<1x256xf32>
    %326 = arith.mulf %325, %87 : vector<1x256xf32>
    %327 = vector.broadcast %20 : f32 to vector<1x256xf32>
    %328 = arith.mulf %327, %326 : vector<1x256xf32>
    %329 = arith.addf %317, %328 : vector<1x256xf32>
    %330 = vector.broadcast %47 : f32 to vector<1x256xf32>
    %331 = arith.mulf %330, %326 : vector<1x256xf32>
    %332 = arith.addf %320, %331 : vector<1x256xf32>
    %333 = vector.broadcast %74 : f32 to vector<1x256xf32>
    %334 = arith.mulf %333, %326 : vector<1x256xf32>
    %335 = arith.addf %323, %334 : vector<1x256xf32>
    %336 = vector.extract_strided_slice %85 {offsets = [0, 2, 127], sizes = [1, 1, 256], strides = [1, 1, 1]} : vector<1x3x512xf32> to vector<1x1x256xf32>
    %337 = vector.shape_cast %336 : vector<1x1x256xf32> to vector<1x256xf32>
    %338 = arith.mulf %337, %86 : vector<1x256xf32>
    %339 = vector.broadcast %21 : f32 to vector<1x256xf32>
    %340 = arith.mulf %339, %338 : vector<1x256xf32>
    %341 = arith.addf %329, %340 : vector<1x256xf32>
    %342 = vector.broadcast %48 : f32 to vector<1x256xf32>
    %343 = arith.mulf %342, %338 : vector<1x256xf32>
    %344 = arith.addf %332, %343 : vector<1x256xf32>
    %345 = vector.broadcast %75 : f32 to vector<1x256xf32>
    %346 = arith.mulf %345, %338 : vector<1x256xf32>
    %347 = arith.addf %335, %346 : vector<1x256xf32>
    %348 = vector.extract_strided_slice %85 {offsets = [0, 2, 128], sizes = [1, 1, 256], strides = [1, 1, 1]} : vector<1x3x512xf32> to vector<1x1x256xf32>
    %349 = vector.shape_cast %348 : vector<1x1x256xf32> to vector<1x256xf32>
    %350 = vector.broadcast %22 : f32 to vector<1x256xf32>
    %351 = arith.mulf %350, %349 : vector<1x256xf32>
    %352 = arith.addf %341, %351 : vector<1x256xf32>
    %353 = vector.broadcast %49 : f32 to vector<1x256xf32>
    %354 = arith.mulf %353, %349 : vector<1x256xf32>
    %355 = arith.addf %344, %354 : vector<1x256xf32>
    %356 = vector.broadcast %76 : f32 to vector<1x256xf32>
    %357 = arith.mulf %356, %349 : vector<1x256xf32>
    %358 = arith.addf %347, %357 : vector<1x256xf32>
    %359 = vector.extract_strided_slice %85 {offsets = [0, 2, 129], sizes = [1, 1, 256], strides = [1, 1, 1]} : vector<1x3x512xf32> to vector<1x1x256xf32>
    %360 = vector.shape_cast %359 : vector<1x1x256xf32> to vector<1x256xf32>
    %361 = arith.mulf %360, %87 : vector<1x256xf32>
    %362 = vector.broadcast %23 : f32 to vector<1x256xf32>
    %363 = arith.mulf %362, %361 : vector<1x256xf32>
    %364 = arith.addf %352, %363 : vector<1x256xf32>
    %365 = vector.broadcast %50 : f32 to vector<1x256xf32>
    %366 = arith.mulf %365, %361 : vector<1x256xf32>
    %367 = arith.addf %355, %366 : vector<1x256xf32>
    %368 = vector.broadcast %77 : f32 to vector<1x256xf32>
    %369 = arith.mulf %368, %361 : vector<1x256xf32>
    %370 = arith.addf %358, %369 : vector<1x256xf32>
    %371 = vector.extract_strided_slice %85 {offsets = [0, 2, 143], sizes = [1, 1, 256], strides = [1, 1, 1]} : vector<1x3x512xf32> to vector<1x1x256xf32>
    %372 = vector.shape_cast %371 : vector<1x1x256xf32> to vector<1x256xf32>
    %373 = arith.mulf %372, %86 : vector<1x256xf32>
    %374 = vector.broadcast %24 : f32 to vector<1x256xf32>
    %375 = arith.mulf %374, %373 : vector<1x256xf32>
    %376 = arith.addf %364, %375 : vector<1x256xf32>
    %377 = vector.broadcast %51 : f32 to vector<1x256xf32>
    %378 = arith.mulf %377, %373 : vector<1x256xf32>
    %379 = arith.addf %367, %378 : vector<1x256xf32>
    %380 = vector.broadcast %78 : f32 to vector<1x256xf32>
    %381 = arith.mulf %380, %373 : vector<1x256xf32>
    %382 = arith.addf %370, %381 : vector<1x256xf32>
    %383 = vector.extract_strided_slice %85 {offsets = [0, 2, 144], sizes = [1, 1, 256], strides = [1, 1, 1]} : vector<1x3x512xf32> to vector<1x1x256xf32>
    %384 = vector.shape_cast %383 : vector<1x1x256xf32> to vector<1x256xf32>
    %385 = vector.broadcast %25 : f32 to vector<1x256xf32>
    %386 = arith.mulf %385, %384 : vector<1x256xf32>
    %387 = arith.addf %376, %386 : vector<1x256xf32>
    %388 = vector.broadcast %52 : f32 to vector<1x256xf32>
    %389 = arith.mulf %388, %384 : vector<1x256xf32>
    %390 = arith.addf %379, %389 : vector<1x256xf32>
    %391 = vector.broadcast %79 : f32 to vector<1x256xf32>
    %392 = arith.mulf %391, %384 : vector<1x256xf32>
    %393 = arith.addf %382, %392 : vector<1x256xf32>
    %394 = vector.extract_strided_slice %85 {offsets = [0, 2, 145], sizes = [1, 1, 256], strides = [1, 1, 1]} : vector<1x3x512xf32> to vector<1x1x256xf32>
    %395 = vector.shape_cast %394 : vector<1x1x256xf32> to vector<1x256xf32>
    %396 = arith.mulf %395, %87 : vector<1x256xf32>
    %397 = vector.broadcast %26 : f32 to vector<1x256xf32>
    %398 = arith.mulf %397, %396 : vector<1x256xf32>
    %399 = arith.addf %387, %398 : vector<1x256xf32>
    %400 = vector.broadcast %53 : f32 to vector<1x256xf32>
    %401 = arith.mulf %400, %396 : vector<1x256xf32>
    %402 = arith.addf %390, %401 : vector<1x256xf32>
    %403 = vector.broadcast %80 : f32 to vector<1x256xf32>
    %404 = arith.mulf %403, %396 : vector<1x256xf32>
    %405 = arith.addf %393, %404 : vector<1x256xf32>
    %c0_18 = arith.constant 0 : index
    %c0_19 = arith.constant 0 : index
    %c0_20 = arith.constant 0 : index
    %406 = vector.load %arg4[%c0_18, %c0_19, %c0_20] : memref<1x3x256xf32, #tpu.memory_space<vmem>>, vector<1x1x256xf32>
    %407 = vector.shape_cast %406 : vector<1x1x256xf32> to vector<1x256xf32>
    %408 = vector.shape_cast %399 : vector<1x256xf32> to vector<1x1x256xf32>
    tpu.vector_store %arg4[%c0_18, %c0_19, %c0_20], %408 {strides = array<i32>} : memref<1x3x256xf32, #tpu.memory_space<vmem>>, vector<1x1x256xf32>,
    %c0_21 = arith.constant 0 : index
    %c1_22 = arith.constant 1 : index
    %c0_23 = arith.constant 0 : index
    %409 = vector.load %arg4[%c0_21, %c1_22, %c0_23] : memref<1x3x256xf32, #tpu.memory_space<vmem>>, vector<1x1x256xf32>
    %410 = vector.shape_cast %409 : vector<1x1x256xf32> to vector<1x256xf32>
    %411 = vector.shape_cast %402 : vector<1x256xf32> to vector<1x1x256xf32>
    tpu.vector_store %arg4[%c0_21, %c1_22, %c0_23], %411 {strides = array<i32>} : memref<1x3x256xf32, #tpu.memory_space<vmem>>, vector<1x1x256xf32>,
    %c0_24 = arith.constant 0 : index
    %c2_25 = arith.constant 2 : index
    %c0_26 = arith.constant 0 : index
    %412 = vector.load %arg4[%c0_24, %c2_25, %c0_26] : memref<1x3x256xf32, #tpu.memory_space<vmem>>, vector<1x1x256xf32>
    %413 = vector.shape_cast %412 : vector<1x1x256xf32> to vector<1x256xf32>
    %414 = vector.shape_cast %405 : vector<1x256xf32> to vector<1x1x256xf32>
    tpu.vector_store %arg4[%c0_24, %c2_25, %c0_26], %414 {strides = array<i32>} : memref<1x3x256xf32, #tpu.memory_space<vmem>>, vector<1x1x256xf32>,
    return
  }
  func.func @transform_0(%arg0: i32) -> (i32, i32, i32) {
    %c0_i32 = arith.constant 0 : i32
    %c0_i32_0 = arith.constant 0 : i32
    %c0_i32_1 = arith.constant 0 : i32
    return %arg0, %c0_i32, %c0_i32_0 : i32, i32, i32
  }
  func.func @transform_1(%arg0: i32) -> i32 {
    %c0_i32 = arith.constant 0 : i32
    %c0_i32_0 = arith.constant 0 : i32
    return %c0_i32 : i32
  }
  func.func @transform_2(%arg0: i32) -> (i32, i32) {
    %c0_i32 = arith.constant 0 : i32
    %c0_i32_0 = arith.constant 0 : i32
    %c0_i32_1 = arith.constant 0 : i32
    return %c0_i32, %c0_i32_0 : i32, i32
  }
  func.func @transform_3(%arg0: i32) -> (i32, i32, i32) {
    %c0_i32 = arith.constant 0 : i32
    %c0_i32_0 = arith.constant 0 : i32
    %c0_i32_1 = arith.constant 0 : i32
    return %arg0, %c0_i32, %c0_i32_0 : i32, i32, i32
  }
}

</mosaic_0001>

<bundles_post_ra>
// kernel: tpu_custom_call.1
= control target key start
LH: loop header
LB: loop body
LE: loop exit
PB: predicated region body
PF: predicated region fallthrough
CT: control target
= control target key end

     0   :  { %8 = vsyncpa [#allocation4], 0  ;;  %s1919_s12 = smov 0   ;;  %s2757_s0 = inlined_call_operand.vmem [shape: f32[2,3,256], index: 0, kind: input, shape index: {}]   ;;  %s2758_s1 = inlined_call_operand.vmem [shape: f32[81], index: 1, kind: input, shape index: {}]   ;;  %s2759_s2 = inlined_call_operand.vmem [shape: f32[2,256], index: 2, kind: input, shape index: {}]   ;;  %s2760_s3 = inlined_call_operand.vmem [shape: f32[2,3,256], index: 3, kind: output, shape index: {}]  }
   0x1 LB: > { %s1660_s13 = sadd.s32 4294967295, %s1888_s12   ;;  %p1662_p0 = scmp.ge.s32.totalorder %s1888_s12, 1  ;;  %s1888_s12 = sphi %s1919_s12, %s14_s12  }
   0x2   : > { %p113_p1 = scmp.lt.s32.totalorder %s1888_s12, 3  ;;  %s125_s16 = sshll.u32 %s2758_s1, 4  ;;  %s126_s16 = int_to_ptr.vmem [resolvable:$true] %s125_s16 }
   0x3   : > { %p1844_p3 = scmp.eq.s32.totalorder %s1660_s13, 0  ;;  %s1890_s17 = smov [#allocation3]  }
   0x4   : > { %p114_p2 = pnand %p1662_p0, %p113_p1 }
   0x6   : > { %p1840_p4 = pneg %p114_p2  ;;  %149 = sbr.rel (%p114_p2) target bundleno = 603 (0x25b), region = 32 }
   0x8   : > { %p1841_p5 = pnand %p1844_p3, %p1840_p4 }
   0xa   : > { %1843 = dma.vmem_to_smem (!%p1841_p5), %s126_s16, 16, %s1890_s17, [#allocation4]  }
   0xb   : > { %1883 = dma.done.wait (%p1844_p3), [#allocation4], 16  }
   0xc   : > { %1885 = vsyncadd (%p1844_p3), [#allocation4], 4294967280 }
   0xd   : > { %156 = sfence }
   0xe   : > { %v1751_v0 = vld [vmem:[%s2759_s2 + $0x1] ss:$2 sm:$0x3]  ;;  %v1891_v1 = vmov 286326784   ;;  %p175_p6 = scmp.lt.s32.totalorder %s1660_s13, 1  ;;  %v1892_v5 = vmov 0.0  }
   0xf   : > { %v277_v2 = vunpack.c.l.s4 %v1891_v1  ;;  %v272_v3 = vld [vmem:[%s2759_s2] ss:$2 sm:$0x3]  ;;  %266 = vst [vmem:[#allocation2] sm:$0x77] %v1892_v5  ;;  %s1671_s23 = sld [smem:[#allocation3 + $0x1]] }
  0x10   : > { %s2768_s13 = smov (!%p175_p6, %s1660_s13), 1  ;;  %267 = vst [vmem:[#allocation2 + $0x8] sm:$0x77] %v1892_v5  ;;  %s1893_s27 = smov 113   ;;  %vm315_vm0 = vcmask 1043456   ;;  %vm283_vm1 = vcmask 908288  }
  0x11   : > { %v278_v4 = vunpack.c.0.s8 %v277_v2  ;;  %s1834_s22 = sshll.u32 %s2768_s13, 3  ;;  %s1894_s28 = smov 111   ;;  %vm365_vm2 = vcmask 924672   ;;  %vm317_vm3 = vcmask 1039360   ;;  %vm443_vm4 = vcmask 916480  }
  0x12   : > { %s179_s26 = scalar_lea.vmem %s2757_s0, %s1834_s22  ;;  %s1698_s29 = sld [smem:[#allocation3 + $0x1c]]  ;;  %vm383_vm5 = vcmask 1031168   ;;  %vm1548_vm6 = vcmask 1042434   ;;  %vm1546_vm7 = vcmask 1040384   ;;  %vm1550_vm8 = vcmask 1041408  }
  0x13   : > { %v1938_v6 = vperm.slane %v1751_v0, %v278_v4  ;;  %v1940_v7 = vperm.slane %v272_v3, %v278_v4  ;;  %v268_v8 = vld [vmem:[%s179_s26] sm:$0x77]  ;;  %s1895_s30 = smov 127   ;;  %s1725_s4 = sld [smem:[#allocation3 + $0x37]]  ;;  %vm1555_vm9 = vcmask 138240  }
  0x14   : > { %269 = vst [vmem:[#allocation2 + $0x4] sm:$0x77] %v268_v8  ;;  %s1701_s5 = sld [smem:[#allocation3 + $0x1f]]  ;;  %s1896_s10 = smov 112  }
  0x15   : > { %362 = vrot.lane.b32.xlu1 %v1938_v6, %s1893_s27  ;;  %280 = vrot.lane.b32.xlu0 %v1940_v7, %s1894_s28  ;;  %v304_v9 = vstv %s1671_s23  ;;  %s1674_s6 = sld [smem:[#allocation3 + $0x4]]  ;;  %s1897_s24 = smov 126  }
  0x16   : > { %423 = vrot.lane.b32.xlu2 %v1940_v7, %s1895_s30  ;;  %s1728_s7 = sld [smem:[#allocation3 + $0x3a]] }
  0x17   : > { %s1680_s8 = sld [smem:[#allocation3 + $0xa]] }
  0x18   : > { %v323_v14 = vstv %s1698_s29  ;;  %s1707_s9 = sld [smem:[#allocation3 + $0x25]] }
  0x19   : > { %v340_v16 = vstv %s1725_s4  ;;  %s1734_s11 = sld [smem:[#allocation3 + $0x40]] }
  0x1a   : > { %v500_v23 = vstv %s1701_s5  ;;  %s2011_s14 = sld [smem:[#allocation3 + $0x1d]] }
  0x1b   : > { %v1954_v10 = vld [vmem:[#allocation2 + $0x8] sm:$0x77]  ;;  %v1956_v11 = vld [vmem:[#allocation2] sm:$0x77]  ;;  %v489_v24 = vstv %s1674_s6  ;;  %s2013_s15 = sld [smem:[#allocation3 + $0x38]] }
  0x1c   : > { %v306_v12 = vmul.f32 %v304_v9, %v1954_v10  ;;  %v305_v13 = vmul.f32 %v304_v9, %v1956_v11  ;;  %v325_v15 = vmul.f32 %v323_v14, %v1954_v10  ;;  %v324_v17 = vmul.f32 %v323_v14, %v1956_v11  ;;  %s2015_s16 = sld [smem:[#allocation3 + $0x2]] }
  0x1d   : > { %v342_v18 = vmul.f32 %v340_v16, %v1954_v10  ;;  %v485_v19 = vrot.slane %v1956_v11, 4  ;;  %v486_v20 = vrot.slane %v1954_v10, 4  ;;  %v341_v21 = vmul.f32 %v340_v16, %v1956_v11  ;;  %s2017_s17 = sld [smem:[#allocation3 + $0x1b]] }
  0x1e   : > { %311 = vrot.lane.b32.xlu1 %v306_v12, %s1895_s30  ;;  %309 = vrot.lane.b32.xlu0 %v305_v13, %s1895_s30  ;;  %v511_v25 = vstv %s1728_s7  ;;  %v734_v29 = vstv %s1680_s8  ;;  %s2019_s18 = sld [smem:[#allocation3]] }
  0x1f   : > { %330 = vrot.lane.b32.xlu2 %v325_v15, %s1895_s30  ;;  %v1972_v22 = vsel %vm315_vm0, %v485_v19, %v486_v20  ;;  %v735_v30 = vmul.f32 %v734_v29, %v1956_v11  ;;  %v755_v31 = vstv %s1707_s9  ;;  %v736_v34 = vmul.f32 %v734_v29, %v1954_v10  ;;  %s2023_s19 = sld [smem:[#allocation3 + $0x39]] }
  0x20   : > { %v501_v26 = vmul.f32 %v500_v23, %v1972_v22  ;;  %v490_v27 = vmul.f32 %v489_v24, %v1972_v22  ;;  %v512_v28 = vmul.f32 %v511_v25, %v1972_v22  ;;  %v756_v33 = vmul.f32 %v755_v31, %v1956_v11  ;;  %s2029_s20 = sld [smem:[#allocation3 + $0x3]] }
  0x21   : > { %v1758_v32 = vrot.slane %v735_v30, 9  ;;  %v757_v35 = vmul.f32 %v755_v31, %v1954_v10  ;;  %v1759_v37 = vrot.slane %v736_v34, 9  ;;  %v776_v38 = vstv %s1734_s11  ;;  %s2037_s21 = sld [smem:[#allocation3 + $0x1e]] }
  0x22   : > { %v1760_v36 = vrot.slane %v756_v33, 9  ;;  %v778_v40 = vmul.f32 %v776_v38, %v1954_v10  ;;  %v777_v41 = vmul.f32 %v776_v38, %v1956_v11  ;;  %v389_v50 = vstv %s2011_s14  ;;  %s2047_s23 = sld [smem:[#allocation3 + $0x36]] }
  0x23   : > { %v1761_v39 = vrot.slane %v757_v35, 9  ;;  %v406_v51 = vstv %s2013_s15  ;;  %v371_v52 = vstv %s2015_s16  ;;  %v294_v53 = vstv %s2017_s17  ;;  %s1708_s25 = sld [smem:[#allocation3 + $0x26]] }
  0x24   : > { %v1763_v42 = vrot.slane %v778_v40, 9  ;;  %v1762_v43 = vrot.slane %v777_v41, 9  ;;  %v289_v57 = vstv %s2019_s18  ;;  %s2104_s26 = sld [smem:[#allocation3 + $0xb]] }
  0x25   : > { %v466_v3 = vstv %s2023_s19  ;;  %s1677_s29 = sld [smem:[#allocation3 + $0x7]] }
  0x26   : > { %328 = vrot.lane.b32.xlu1 %v324_v17, %s1895_s30  ;;  %347 = vrot.lane.b32.xlu0 %v342_v18, %s1895_s30  ;;  %v431_v4 = vstv %s2029_s20  ;;  %s1731_s4 = sld [smem:[#allocation3 + $0x3d]] }
  0x27   : > { %345 = vrot.lane.b32.xlu2 %v341_v21, %s1895_s30  ;;  %v449_v12 = vstv %s2037_s21  ;;  %s1729_s5 = sld [smem:[#allocation3 + $0x3b]] }
  0x28   : > { %v299_v19 = vstv %s2047_s23  ;;  %s1702_s6 = sld [smem:[#allocation3 + $0x20]] }
  0x29   : > { %s1675_s7 = sld [smem:[#allocation3 + $0x5]] }
  0x2a   : > { %s1730_s8 = sld [smem:[#allocation3 + $0x3c]] }
  0x2b   : > { %s1676_s9 = sld [smem:[#allocation3 + $0x6]] }
  0x2c   : > { %s1703_s11 = sld [smem:[#allocation3 + $0x21]] }
  0x2d   : > { %s1732_s14 = sld [smem:[#allocation3 + $0x3e]] }
  0x2e   : > { %503 = vrot.lane.b32.xlu1 %v501_v26, %s1894_s28  ;;  %492 = vrot.lane.b32.xlu0 %v490_v27, %s1894_s28  ;;  %s1705_s15 = sld [smem:[#allocation3 + $0x23]] }
  0x2f   : > { %514 = vrot.lane.b32.xlu2 %v512_v28, %s1894_s28  ;;  %s1735_s16 = sld [smem:[#allocation3 + $0x41]] }
  0x30   : > { %s1678_s17 = sld [smem:[#allocation3 + $0x8]] }
  0x31   : > { %s1682_s18 = sld [smem:[#allocation3 + $0xc]] }
  0x32   : > { %s1709_s19 = sld [smem:[#allocation3 + $0x27]] }
  0x33   : > { %s1736_s20 = sld [smem:[#allocation3 + $0x42]] }
  0x34   : > { %s1683_s21 = sld [smem:[#allocation3 + $0xd]] }
  0x35   : > { %s1737_s23 = sld [smem:[#allocation3 + $0x43]] }
  0x36   : > { %524 = vrot.lane.b32.xlu1 %v1954_v10, %s1895_s30  ;;  %522 = vrot.lane.b32.xlu0 %v1956_v11, %s1895_s30 }
  0x37   : > { %566 = vrot.lane.b32.xlu2 %v1956_v11, %s1893_s27 }
  0x3e   : > { %610 = vrot.lane.b32.xlu1 %v1956_v11, %s1896_s10  ;;  %568 = vrot.lane.b32.xlu0 %v1954_v10, %s1893_s27  ;;  %s1704_s27 = sld [smem:[#allocation3 + $0x22]] }
  0x3f   : > { %612 = vrot.lane.b32.xlu2 %v1954_v10, %s1896_s10 }
  0x46   : > { %654 = vrot.lane.b32.xlu1 %v1954_v10, %s1894_s28  ;;  %652 = vrot.lane.b32.xlu0 %v1956_v11, %s1894_s28 }
  0x47   : > { %743 = vrot.lane.b32.xlu2 %v1758_v32, %s1895_s30 }
  0x4e   : > { %764 = vrot.lane.b32.xlu1 %v1760_v36, %s1895_s30  ;;  %745 = vrot.lane.b32.xlu0 %v1759_v37, %s1895_s30 }
  0x4f   : > { %766 = vrot.lane.b32.xlu2 %v1761_v39, %s1895_s30 }
  0x56   : > { %787 = vrot.lane.b32.xlu1 %v1763_v42, %s1895_s30  ;;  %785 = vrot.lane.b32.xlu0 %v1762_v43, %s1895_s30 }
  0x70   : > { %v2009_v44 = vpop.permute.xlu2 %423 }
  0x71   : > { %v425_v62 = vrot.slane %v2009_v44, 4 }
  0x73   : > { %v2061_v2 = vmul.f32 %v425_v62, %v1954_v10  ;;  %v426_v40 = vsel %vm317_vm3, %v425_v62, %v2009_v44 }
  0x75   : > { %v468_v17 = vmul.f32 %v466_v3, %v2061_v2  ;;  %v433_v18 = vmul.f32 %v431_v4, %v2061_v2  ;;  %v451_v23 = vmul.f32 %v449_v12, %v2061_v2 }
  0x79   : > { %v2021_v45 = vpop.permute.xlu2 %330 }
  0x7a   : > { %v333_v29 = vrot.slane %v2021_v45, 4 }
  0x81   : > { %v346_v5 = vpop.permute.xlu2 %345 }
  0x82   : > { %v349_v28 = vrot.slane %v346_v5, 4 }
  0x87   : > { %v363_v46 = vpop.permute.xlu1 %362  ;;  %v281_v47 = vpop.permute.xlu0 %280 }
  0x88   : > { %v364_v48 = vrot.slane %v363_v46, 4  ;;  %v282_v49 = vrot.slane %v281_v47, 4 }
  0x89   : > { %v2092_v39 = vpop.permute.xlu2 %514 }
  0x8a   : > { %v2032_v54 = vmul.f32 %v364_v48, %v1954_v10  ;;  %v2035_v55 = vmul.f32 %v282_v49, %v1954_v10  ;;  %v284_v56 = vsel %vm283_vm1, %v282_v49, %v281_v47  ;;  %v366_v20 = vsel %vm365_vm2, %v364_v48, %v363_v46 }
  0x8b   : > { %v2056_v0 = vmul.f32 %v284_v56, %v1956_v11  ;;  %v2083_v27 = vmul.f32 %v366_v20, %v1956_v11  ;;  %v2113_v48 = vmul.f32 %v426_v40, %v1956_v11  ;;  %v619_v20 = vstv %s1677_s29  ;;  %s1711_s29 = sld [smem:[#allocation3 + $0x29]] }
  0x8c   : > { %v391_v58 = vmul.f32 %v389_v50, %v2032_v54  ;;  %v408_v59 = vmul.f32 %v406_v51, %v2032_v54  ;;  %v373_v60 = vmul.f32 %v371_v52, %v2032_v54  ;;  %v296_v61 = vmul.f32 %v294_v53, %v2035_v55 }
  0x8d   : > { %v291_v1 = vmul.f32 %v289_v57, %v2035_v55  ;;  %v290_v15 = vmul.f32 %v289_v57, %v2056_v0  ;;  %v301_v26 = vmul.f32 %v299_v19, %v2035_v55  ;;  %v295_v31 = vmul.f32 %v294_v53, %v2056_v0 }
  0x8e   : > { %396 = vrot.lane.b32.xlu2 %v391_v58, %s1897_s24  ;;  %413 = vrot.lane.b32.xlu1 %v408_v59, %s1897_s24  ;;  %v2053_v63 = vadd.f32 %v2021_v45, %v296_v61  ;;  %v300_v34 = vmul.f32 %v299_v19, %v2056_v0  ;;  %v372_v37 = vmul.f32 %v371_v52, %v2083_v27  ;;  %v818_v57 = vstv %s1708_s25  ;;  %s1710_s25 = sld [smem:[#allocation3 + $0x28]] }
  0x8f   : > { %378 = vrot.lane.b32.xlu0 %v373_v60, %s1897_s24  ;;  %v390_v38 = vmul.f32 %v389_v50, %v2083_v27  ;;  %v407_v43 = vmul.f32 %v406_v51, %v2083_v27  ;;  %v450_v51 = vmul.f32 %v449_v12, %v2113_v48  ;;  %v467_v52 = vmul.f32 %v466_v3, %v2113_v48 }
  0x90   : > { %v312_v8 = vpop.permute.xlu1 %311  ;;  %v310_v9 = vpop.permute.xlu0 %309  ;;  %v432_v56 = vmul.f32 %v431_v4, %v2113_v48  ;;  %v797_v58 = vstv %s2104_s26  ;;  %v820_v59 = vmul.f32 %v818_v57, %v2032_v54  ;;  %v819_v60 = vmul.f32 %v818_v57, %v2083_v27  ;;  %s1684_s26 = sld [smem:[#allocation3 + $0xe]] }
  0x91   : > { %v314_v13 = vrot.slane %v312_v8, 4  ;;  %v2066_v14 = vadd.f32 %v312_v8, %v291_v1  ;;  %v313_v16 = vrot.slane %v310_v9, 4  ;;  %v567_v53 = vpop.permute.xlu2 %566  ;;  %v799_v61 = vmul.f32 %v797_v58, %v2032_v54 }
  0x92   : > { %v1767_v3 = vrot.slane %v820_v59, 9  ;;  %v630_v19 = vstv %s1704_s27  ;;  %v577_v59 = vstv %s1676_s9  ;;  %s1738_s27 = sld [smem:[#allocation3 + $0x44]] }
  0x93   : > { %v316_v21 = vsel %vm315_vm0, %v313_v16, %v314_v13  ;;  %v1765_v4 = vrot.slane %v799_v61, 9  ;;  %s1713_s9 = sld [smem:[#allocation3 + $0x2b]] }
  0x94   : > { %v318_v24 = vsel %vm317_vm3, %v310_v9, %v316_v21  ;;  %v798_v9 = vmul.f32 %v797_v58, %v2083_v27  ;;  %v599_v58 = vstv %s1730_s8  ;;  %s2223_s8 = sld [smem:[#allocation3 + $0x46]] }
  0x95   : > { %v2078_v25 = vadd.f32 %v318_v24, %v290_v15 }
  0x96   : > { %473 = vrot.lane.b32.xlu2 %v468_v17, %s1896_s10  ;;  %438 = vrot.lane.b32.xlu1 %v433_v18, %s1896_s10  ;;  %v1764_v18 = vrot.slane %v798_v9, 9 }
  0x97   : > { %456 = vrot.lane.b32.xlu0 %v451_v23, %s1896_s10 }
  0x98   : > { %v329_v30 = vpop.permute.xlu1 %328  ;;  %v348_v32 = vpop.permute.xlu0 %347 }
  0x99   : > { %v332_v33 = vrot.slane %v329_v30, 4  ;;  %v350_v35 = vrot.slane %v348_v32, 4  ;;  %v2088_v36 = vadd.f32 %v348_v32, %v301_v26  ;;  %v613_v8 = vpop.permute.xlu2 %612  ;;  %v641_v32 = vstv %s1731_s4  ;;  %s1685_s4 = sld [smem:[#allocation3 + $0xf]] }
  0x9a   : > { %v615_v15 = vrot.slane %v613_v8, 4 }
  0x9b   : > { %v334_v41 = vsel %vm315_vm0, %v332_v33, %v333_v29  ;;  %v351_v42 = vsel %vm315_vm0, %v349_v28, %v350_v35  ;;  %v570_v33 = vrot.slane %v567_v53, 4  ;;  %v533_v53 = vstv %s1675_s7  ;;  %s1686_s7 = sld [smem:[#allocation3 + $0x10]] }
  0x9c   : > { %v335_v45 = vsel %vm317_vm3, %v329_v30, %v334_v41  ;;  %v352_v46 = vsel %vm317_vm3, %v346_v5, %v351_v42  ;;  %v1766_v5 = vrot.slane %v819_v60, 9 }
  0x9d   : > { %v2107_v44 = vadd.f32 %v335_v45, %v295_v31  ;;  %v2110_v47 = vadd.f32 %v352_v46, %v300_v34 }
  0x9e   : > { %376 = vrot.lane.b32.xlu2 %v372_v37, %s1897_s24  ;;  %394 = vrot.lane.b32.xlu1 %v390_v38, %s1897_s24  ;;  %v555_v37 = vstv %s1729_s5  ;;  %v544_v38 = vstv %s1702_s6  ;;  %s1739_s5 = sld [smem:[#allocation3 + $0x45]] }
  0x9f   : > { %411 = vrot.lane.b32.xlu0 %v407_v43, %s1897_s24  ;;  %s1712_s6 = sld [smem:[#allocation3 + $0x2a]] }
  0xa0   : > { %v2115_v49 = vpop.permute.xlu1 %503  ;;  %v2117_v50 = vpop.permute.xlu0 %492 }
  0xa6   : > { %454 = vrot.lane.b32.xlu2 %v450_v51, %s1896_s10  ;;  %471 = vrot.lane.b32.xlu1 %v467_v52, %s1896_s10 }
  0xa7   : > { %436 = vrot.lane.b32.xlu0 %v432_v56, %s1896_s10 }
  0xa8   : > { %v525_v62 = vpop.permute.xlu1 %524  ;;  %v523_v1 = vpop.permute.xlu0 %522 }
  0xa9   : > { %v527_v12 = vrot.slane %v525_v62, 4  ;;  %v526_v13 = vrot.slane %v523_v1, 4 }
  0xab   : > { %v528_v21 = vsel %vm315_vm0, %v526_v13, %v527_v12  ;;  %v839_v13 = vstv %s1735_s16  ;;  %s2250_s16 = sld [smem:[#allocation3 + $0x13]] }
  0xac   : > { %v529_v30 = vsel %vm317_vm3, %v528_v21, %v525_v62 }
  0xad   : > { %v2145_v34 = vmul.f32 %v529_v30, %v1938_v6 }
  0xae   : > { %829 = vrot.lane.b32.xlu2 %v1767_v3, %s1897_s24  ;;  %827 = vrot.lane.b32.xlu1 %v1766_v5, %s1897_s24 }
  0xaf   : > { %808 = vrot.lane.b32.xlu0 %v1765_v4, %s1897_s24  ;;  %v556_v43 = vmul.f32 %v555_v37, %v2145_v34  ;;  %v545_v45 = vmul.f32 %v544_v38, %v2145_v34  ;;  %v534_v57 = vmul.f32 %v533_v53, %v2145_v34  ;;  %v684_v4 = vstv %s1732_s14  ;;  %s2233_s14 = sld [smem:[#allocation3 + $0x47]] }
  0xb0   : > { %v611_v16 = vpop.permute.xlu1 %610  ;;  %v569_v26 = vpop.permute.xlu0 %568  ;;  %v902_v37 = vstv %s1736_s20  ;;  %s2318_s20 = sld [smem:[#allocation3 + $0x2f]] }
  0xb1   : > { %v614_v17 = vrot.slane %v611_v16, 4  ;;  %v571_v31 = vrot.slane %v569_v26, 4  ;;  %v840_v16 = vmul.f32 %v839_v13, %v2083_v27  ;;  %v904_v38 = vmul.f32 %v902_v37, %v2061_v2 }
  0xb3   : > { %v616_v23 = vsel %vm315_vm0, %v614_v17, %v615_v15  ;;  %v572_v40 = vsel %vm315_vm0, %v570_v33, %v571_v31  ;;  %v662_v15 = vstv %s1678_s17  ;;  %v1768_v21 = vrot.slane %v840_v16, 9  ;;  %s2260_s17 = sld [smem:[#allocation3 + $0x2e]] }
  0xb4   : > { %v2136_v24 = vsel %vm443_vm4, %v616_v23, %v613_v8  ;;  %v573_v46 = vsel %vm365_vm2, %v572_v40, %v569_v26  ;;  %v673_v8 = vstv %s1705_s15  ;;  %v881_v26 = vstv %s1709_s19  ;;  %s2239_s15 = sld [smem:[#allocation3 + $0x2c]] }
  0xb5   : > { %v631_v28 = vmul.f32 %v630_v19, %v2136_v24  ;;  %v620_v29 = vmul.f32 %v619_v20, %v2136_v24  ;;  %v642_v35 = vmul.f32 %v641_v32, %v2136_v24  ;;  %v2156_v56 = vmul.f32 %v573_v46, %v1940_v7  ;;  %s2305_s19 = sld [smem:[#allocation3 + $0x14]] }
  0xb6   : > { %806 = vrot.lane.b32.xlu2 %v1764_v18, %s1897_s24  ;;  %v588_v7 = vstv %s1703_s11  ;;  %v2178_v18 = vpop.permute.xlu2 %743  ;;  %v860_v19 = vstv %s1682_s18  ;;  %v903_v40 = vmul.f32 %v902_v37, %v2113_v48  ;;  %v936_v46 = vstv %s1710_s25  ;;  %s2230_s11 = sld [smem:[#allocation3 + $0x11]] }
  0xb7   : > { %633 = vrot.lane.b32.xlu1 %v631_v28, %s1894_s28  ;;  %622 = vrot.lane.b32.xlu0 %v620_v29, %s1894_s28  ;;  %v600_v61 = vmul.f32 %v599_v58, %v2156_v56  ;;  %v578_v62 = vmul.f32 %v577_v59, %v2156_v56  ;;  %v589_v5 = vmul.f32 %v588_v7, %v2156_v56  ;;  %s2292_s18 = sld [smem:[#allocation3 + $0x49]] }
  0xb8   : > { %v655_v41 = vpop.permute.xlu1 %654  ;;  %v653_v42 = vpop.permute.xlu0 %652  ;;  %v861_v23 = vmul.f32 %v860_v19, %v2113_v48  ;;  %v882_v28 = vmul.f32 %v881_v26, %v2113_v48  ;;  %v862_v29 = vmul.f32 %v860_v19, %v2061_v2  ;;  %v937_v59 = vmul.f32 %v936_v46, %v1972_v22  ;;  %s2354_s25 = sld [smem:[#allocation3 + $0x30]] }
  0xb9   : > { %v657_v51 = vrot.slane %v655_v41, 4  ;;  %v656_v52 = vrot.slane %v653_v42, 4 }
  0xba   : > { %v1770_v30 = vrot.slane %v861_v23, 9  ;;  %v1772_v32 = vrot.slane %v882_v28, 9  ;;  %v1771_v33 = vrot.slane %v862_v29, 9  ;;  %v1777_v7 = vrot.slane %v937_v59, 9 }
  0xbb   : > { %v658_v60 = vsel %vm315_vm0, %v656_v52, %v657_v51  ;;  %v1775_v51 = vrot.slane %v904_v38, 9  ;;  %v1774_v52 = vrot.slane %v903_v40, 9  ;;  %v1014_v28 = vstv %s1712_s6  ;;  %s2408_s6 = sld [smem:[#allocation3 + $0x32]] }
  0xbc   : > { %v659_v1 = vsel %vm283_vm1, %v658_v60, %v655_v41  ;;  %v923_v41 = vstv %s1683_s21  ;;  %v516_v59 = vrot.slane %v2092_v39, 4  ;;  %s2342_s21 = sld [smem:[#allocation3 + $0x4a]] }
  0xbd   : > { %v2167_v3 = vmul.f32 %v659_v1, %v1938_v6  ;;  %v841_v6 = vmul.f32 %v839_v13, %v2032_v54 }
  0xbe   : > { %644 = vrot.lane.b32.xlu2 %v642_v35, %s1894_s28  ;;  %v2187_v31 = vpop.permute.xlu2 %766  ;;  %v883_v35 = vmul.f32 %v881_v26, %v2061_v2  ;;  %v1027_v26 = vstv %s1739_s5  ;;  %s2400_s5 = sld [smem:[#allocation3 + $0x4d]] }
  0xbf   : > { %558 = vrot.lane.b32.xlu1 %v556_v43, %s1894_s28  ;;  %547 = vrot.lane.b32.xlu0 %v545_v45, %s1894_s28  ;;  %v685_v9 = vmul.f32 %v684_v4, %v2167_v3  ;;  %v674_v12 = vmul.f32 %v673_v8, %v2167_v3  ;;  %v663_v17 = vmul.f32 %v662_v15, %v2167_v3  ;;  %v1769_v20 = vrot.slane %v841_v6, 9 }
  0xc0   : > { %v1773_v42 = vrot.slane %v883_v35, 9  ;;  %v924_v43 = vmul.f32 %v923_v41, %v1972_v22  ;;  %v949_v45 = vstv %s1737_s23  ;;  %v988_v8 = vstv %s1738_s27  ;;  %s2348_s23 = sld [smem:[#allocation3 + $0x15]] }
  0xc1   : > { %v950_v58 = vmul.f32 %v949_v45, %v1972_v22  ;;  %v1001_v6 = vstv %s1685_s4  ;;  %v1028_v29 = vmul.f32 %v1027_v26, %v2156_v56  ;;  %s2377_s27 = sld [smem:[#allocation3 + $0x3f]] }
  0xc2   : > { %v1776_v60 = vrot.slane %v924_v43, 9  ;;  %v1002_v23 = vmul.f32 %v1001_v6, %v2156_v56  ;;  %v1053_v43 = vstv %s1713_s9  ;;  %s2397_s4 = sld [smem:[#allocation3 + $0x17]] }
  0xc3   : > { %v1778_v1 = vrot.slane %v950_v58, 9  ;;  %v1784_v35 = vrot.slane %v1028_v29, 9  ;;  %s2512_s9 = sld [smem:[#allocation3 + $0x18]] }
  0xc6   : > { %536 = vrot.lane.b32.xlu2 %v534_v57, %s1894_s28 }
  0xc7   : > { %602 = vrot.lane.b32.xlu0 %v600_v61, %s1894_s28  ;;  %580 = vrot.lane.b32.xlu1 %v578_v62, %s1894_s28  ;;  %v2206_v61 = vpop.permute.xlu1 %764  ;;  %v2208_v62 = vpop.permute.xlu0 %745 }
  0xce   : > { %591 = vrot.lane.b32.xlu2 %v589_v5, %s1894_s28  ;;  %v962_v5 = vstv %s1684_s26  ;;  %s2358_s26 = sld [smem:[#allocation3 + $0x4b]] }
  0xcf   : > { %687 = vrot.lane.b32.xlu1 %v685_v9, %s1894_s28  ;;  %676 = vrot.lane.b32.xlu0 %v674_v12, %s1894_s28  ;;  %v963_v4 = vmul.f32 %v962_v5, %v2145_v34  ;;  %v975_v9 = vstv %s1711_s29  ;;  %v989_v12 = vmul.f32 %v988_v8, %v2145_v34  ;;  %v2219_v16 = vpop.permute.xlu1 %787  ;;  %s2380_s29 = sld [smem:[#allocation3 + $0x24]] }
  0xd0   : > { %v976_v13 = vmul.f32 %v975_v9, %v2145_v34 }
  0xd1   : > { %v1779_v15 = vrot.slane %v963_v4, 9  ;;  %v1781_v19 = vrot.slane %v989_v12, 9  ;;  %v1079_v4 = vstv %s2230_s11  ;;  %s2544_s11 = sld [smem:[#allocation3 + $0x33]] }
  0xd6   : > { %665 = vrot.lane.b32.xlu2 %v663_v17, %s1894_s28  ;;  %v2221_v17 = vpop.permute.xlu0 %785 }
  0xd7   : > { %850 = vrot.lane.b32.xlu1 %v1769_v20, %s1897_s24  ;;  %848 = vrot.lane.b32.xlu0 %v1768_v21, %s1897_s24  ;;  %v1780_v20 = vrot.slane %v976_v13, 9 }
  0xde   : > { %869 = vrot.lane.b32.xlu2 %v1770_v30, %s1896_s10  ;;  %v1015_v30 = vmul.f32 %v1014_v28, %v2156_v56  ;;  %v505_v28 = vrot.slane %v2115_v49, 4 }
  0xdf   : > { %890 = vrot.lane.b32.xlu1 %v1772_v32, %s1896_s10  ;;  %871 = vrot.lane.b32.xlu0 %v1771_v33, %s1896_s10  ;;  %v1782_v32 = vrot.slane %v1002_v23, 9  ;;  %v1040_v33 = vstv %s1686_s7  ;;  %v494_v23 = vrot.slane %v2117_v50, 4  ;;  %s2435_s7 = sld [smem:[#allocation3 + $0x16]] }
  0xe0   : > { %v1783_v37 = vrot.slane %v1015_v30, 9  ;;  %v1041_v41 = vmul.f32 %v1040_v33, %v2136_v24 }
  0xe2   : > { %v1785_v5 = vrot.slane %v1041_v41, 9  ;;  %v1157_v41 = vstv %s2250_s16  ;;  %s2569_s16 = sld [smem:[#allocation3 + $0x34]] }
  0xe6   : > { %892 = vrot.lane.b32.xlu2 %v1773_v42, %s1896_s10  ;;  %v1066_v42 = vstv %s2223_s8  ;;  %s2452_s8 = sld [smem:[#allocation3 + $0x31]] }
  0xe7   : > { %913 = vrot.lane.b32.xlu1 %v1775_v51, %s1896_s10  ;;  %911 = vrot.lane.b32.xlu0 %v1774_v52, %s1896_s10 }
  0xe8   : > { %v2196_v53 = vpop.permute.xlu2 %396 }
  0xe9   : > { %v2200_v57 = vadd.f32 %v2196_v53, %v2053_v63 }
  0xee   : > { %928 = vrot.lane.b32.xlu2 %v1776_v60, %s1894_s28 }
  0xef   : > { %954 = vrot.lane.b32.xlu1 %v1778_v1, %s1894_s28  ;;  %941 = vrot.lane.b32.xlu0 %v1777_v7, %s1894_s28  ;;  %v1067_v1 = vmul.f32 %v1066_v42, %v2136_v24  ;;  %v1054_v7 = vmul.f32 %v1053_v43, %v2136_v24 }
  0xf0   : > { %v2211_v63 = vpop.permute.xlu2 %473 }
  0xf1   : > { %v1787_v12 = vrot.slane %v1067_v1, 9  ;;  %v1786_v13 = vrot.slane %v1054_v7, 9  ;;  %v399_v7 = vrot.slane %v2196_v53, 4 }
  0xf6   : > { %967 = vrot.lane.b32.xlu2 %v1779_v15, %s1894_s28 }
  0xf7   : > { %993 = vrot.lane.b32.xlu1 %v1781_v19, %s1894_s28  ;;  %980 = vrot.lane.b32.xlu0 %v1780_v20, %s1894_s28  ;;  %v1080_v19 = vmul.f32 %v1079_v4, %v2167_v3  ;;  %v1105_v20 = vstv %s2233_s14  ;;  %v1159_v4 = vmul.f32 %v1157_v41, %v1954_v10  ;;  %s2559_s14 = sld [smem:[#allocation3 + $0x19]] }
  0xf8   : > { %v377_v21 = vpop.permute.xlu2 %376 }
  0xf9   : > { %v380_v51 = vrot.slane %v377_v21, 4 }
  0xfe   : > { %1006 = vrot.lane.b32.xlu2 %v1782_v32, %s1894_s28 }
  0xff   : > { %1032 = vrot.lane.b32.xlu1 %v1784_v35, %s1894_s28  ;;  %1019 = vrot.lane.b32.xlu0 %v1783_v37, %s1894_s28  ;;  %v1106_v35 = vmul.f32 %v1105_v20, %v2167_v3 }
 0x100   : > { %v455_v38 = vpop.permute.xlu2 %454  ;;  %v2235_v40 = vpop.permute.xlu1 %413 }
 0x101   : > { %v422_v45 = vadd.f32 %v2235_v40, %v2088_v36  ;;  %v379_v46 = vpop.permute.xlu0 %378  ;;  %v458_v29 = vrot.slane %v455_v38, 4 }
 0x102   : > { %v381_v52 = vrot.slane %v379_v46, 4  ;;  %v388_v58 = vadd.f32 %v379_v46, %v2066_v14 }
 0x103   : > { %v482_v60 = vadd.f32 %v2211_v63, %v422_v45  ;;  %v1788_v45 = vrot.slane %v1080_v19, 9 }
 0x104   : > { %v382_v36 = vsel %vm315_vm0, %v380_v51, %v381_v52  ;;  %v1178_v51 = vstv %s2260_s17  ;;  %v1790_v52 = vrot.slane %v1106_v35, 9  ;;  %s2593_s17 = sld [smem:[#allocation3 + $0x1a]] }
 0x105   : > { %v384_v8 = vsel %vm383_vm5, %v377_v21, %v382_v36  ;;  %v2257_v14 = vadd.f32 %v516_v59, %v482_v60  ;;  %v1092_v21 = vstv %s2239_s15  ;;  %s2566_s15 = sld [smem:[#allocation3 + $0x4f]] }
 0x106   : > { %1045 = vrot.lane.b32.xlu2 %v1785_v5, %s1894_s28  ;;  %v2263_v9 = vadd.f32 %v384_v8, %v2078_v25  ;;  %v1093_v37 = vmul.f32 %v1092_v21, %v2167_v3  ;;  %v1179_v5 = vmul.f32 %v1178_v51, %v1956_v11  ;;  %v416_v8 = vrot.slane %v2235_v40, 4 }
 0x107   : > { %1071 = vrot.lane.b32.xlu1 %v1787_v12, %s1894_s28  ;;  %1058 = vrot.lane.b32.xlu0 %v1786_v13, %s1894_s28  ;;  %v1180_v40 = vmul.f32 %v1178_v51, %v1954_v10 }
 0x108   : > { %v2265_v15 = vpop.permute.xlu2 %829  ;;  %v2267_v6 = vpop.permute.xlu1 %438 }
 0x109   : > { %v448_v26 = vadd.f32 %v2267_v6, %v388_v58  ;;  %v457_v25 = vpop.permute.xlu0 %456  ;;  %v1789_v58 = vrot.slane %v1093_v37, 9  ;;  %v506_v37 = vsel %vm283_vm1, %v505_v28, %v2115_v49  ;;  %v441_v49 = vrot.slane %v2267_v6, 4 }
 0x10a   : > { %v459_v30 = vrot.slane %v457_v25, 4  ;;  %v465_v32 = vadd.f32 %v457_v25, %v2200_v57  ;;  %v1158_v57 = vmul.f32 %v1157_v41, %v1956_v11  ;;  %v1799_v25 = vrot.slane %v1179_v5, 10 }
 0x10b   : > { %v2280_v33 = vadd.f32 %v494_v23, %v448_v26  ;;  %v476_v41 = vrot.slane %v2211_v63, 4 }
 0x10c   : > { %v460_v42 = vsel %vm315_vm0, %v458_v29, %v459_v30  ;;  %v2286_v43 = vadd.f32 %v505_v28, %v465_v32  ;;  %v1797_v13 = vrot.slane %v1158_v57, 10  ;;  %v1798_v29 = vrot.slane %v1159_v4, 10 }
 0x10d   : > { %v461_v46 = vsel %vm443_vm4, %v455_v38, %v460_v42  ;;  %v1199_v32 = vstv %s2292_s18  ;;  %v1800_v28 = vrot.slane %v1180_v40, 10  ;;  %v495_v4 = vsel %vm283_vm1, %v494_v23, %v2117_v50  ;;  %s2603_s18 = sld [smem:[#allocation3 + $0x50]] }
 0x10e   : > { %1084 = vrot.lane.b32.xlu2 %v1788_v45, %s1894_s28  ;;  %v1201_v57 = vmul.f32 %v1199_v32, %v1954_v10 }
 0x10f   : > { %1110 = vrot.lane.b32.xlu1 %v1790_v52, %s1894_s28  ;;  %1097 = vrot.lane.b32.xlu0 %v1789_v58, %s1894_s28 }
 0x110   : > { %v2294_v60 = vpop.permute.xlu2 %806  ;;  %v395_v1 = vpop.permute.xlu1 %394  ;;  %v1802_v10 = vrot.slane %v1201_v57, 10 }
 0x111   : > { %v398_v36 = vrot.slane %v395_v1, 4  ;;  %v412_v38 = vpop.permute.xlu0 %411  ;;  %v810_v50 = vrot.slane %v2294_v60, 4 }
 0x112   : > { %v415_v12 = vrot.slane %v412_v38, 4 }
 0x113   : > { %v400_v19 = vsel %vm315_vm0, %v398_v36, %v399_v7  ;;  %v1220_v7 = vstv %s2305_s19  ;;  %s2605_s19 = sld [smem:[#allocation3 + $0x35]] }
 0x114   : > { %v401_v20 = vsel %vm383_vm5, %v395_v1, %v400_v19  ;;  %v417_v53 = vsel %vm315_vm0, %v415_v12, %v416_v8  ;;  %v1221_v19 = vmul.f32 %v1220_v7, %v2083_v27 }
 0x115   : > { %v404_v21 = vadd.f32 %v401_v20, %v2107_v44  ;;  %v418_v26 = vsel %vm383_vm5, %v412_v38, %v417_v53  ;;  %v1241_v20 = vstv %s2318_s20  ;;  %s2611_s20 = sld [smem:[#allocation3 + $0x12]] }
 0x116   : > { %v421_v30 = vadd.f32 %v418_v26, %v2110_v47  ;;  %1166 = vrot.lane.b32.xlu2 %v1797_v13, %s1895_s30  ;;  %v1242_v26 = vmul.f32 %v1241_v20, %v2083_v27  ;;  %v1803_v40 = vrot.slane %v1221_v19, 10 }
 0x117   : > { %v464_v35 = vadd.f32 %v461_v46, %v404_v21  ;;  %1187 = vrot.lane.b32.xlu1 %v1799_v25, %s1895_s30  ;;  %1168 = vrot.lane.b32.xlu0 %v1798_v29, %s1895_s30  ;;  %v1200_v46 = vmul.f32 %v1199_v32, %v1956_v11  ;;  %v517_v11 = vsel %vm283_vm1, %v516_v59, %v2092_v39 }
 0x118   : > { %v2316_v42 = vpop.permute.xlu2 %644  ;;  %v472_v44 = vpop.permute.xlu1 %471  ;;  %v1222_v25 = vmul.f32 %v1220_v7, %v2032_v54 }
 0x119   : > { %v475_v45 = vrot.slane %v472_v44, 4  ;;  %v437_v47 = vpop.permute.xlu0 %436  ;;  %v2324_v51 = vadd.f32 %v506_v37, %v464_v35  ;;  %v1801_v5 = vrot.slane %v1200_v46, 10 }
 0x11a   : > { %v440_v63 = vrot.slane %v437_v47, 4  ;;  %v1804_v35 = vrot.slane %v1222_v25, 10 }
 0x11b   : > { %v477_v52 = vsel %vm315_vm0, %v475_v45, %v476_v41  ;;  %v1243_v41 = vmul.f32 %v1241_v20, %v2032_v54  ;;  %v1304_v45 = vstv %s2354_s25 }
 0x11c   : > { %v478_v58 = vsel %vm443_vm4, %v472_v44, %v477_v52  ;;  %v442_v1 = vsel %vm315_vm0, %v440_v63, %v441_v49  ;;  %v1262_v44 = vstv %s2342_s21  ;;  %s1742_s21 = sld [smem:[#allocation3 + $0x48]] }
 0x11d   : > { %v481_v36 = vadd.f32 %v478_v58, %v421_v30  ;;  %v444_v38 = vsel %vm443_vm4, %v437_v47, %v442_v1  ;;  %v1325_v47 = vstv %s2358_s26  ;;  %v1264_v49 = vmul.f32 %v1262_v44, %v2032_v54 }
 0x11e   : > { %v447_v6 = vadd.f32 %v444_v38, %v2263_v9  ;;  %1189 = vrot.lane.b32.xlu2 %v1800_v28, %s1895_s30  ;;  %v1263_v63 = vmul.f32 %v1262_v44, %v2083_v27  ;;  %v1806_v28 = vrot.slane %v1243_v41, 10  ;;  %v1305_v1 = vmul.f32 %v1304_v45, %v2113_v48 }
 0x11f   : > { %v2344_v8 = vadd.f32 %v517_v11, %v481_v36  ;;  %1210 = vrot.lane.b32.xlu1 %v1802_v10, %s1895_s30  ;;  %1208 = vrot.lane.b32.xlu0 %v1801_v5, %s1895_s30  ;;  %s2371_s30 = sld [smem:[#allocation3 + $0x9]]  ;;  %v2406_v36 = vmul.f32 %v1325_v47, %v2113_v48  ;;  %v2412_v54 = vmul.f32 %v1304_v45, %v2061_v2  ;;  %v721_v38 = vstv %s2377_s27 }
 0x120   : > { %v537_v12 = vpop.permute.xlu2 %536  ;;  %v498_v13 = vadd.f32 %v495_v4, %v447_v6  ;;  %v2360_v23 = vpop.permute.xlu1 %827  ;;  %v2415_v27 = vmul.f32 %v1325_v47, %v2061_v2  ;;  %v708_v10 = vstv %s2380_s29  ;;  %v1808_v5 = vrot.slane %v1264_v49, 10 }
 0x121   : > { %v538_v39 = vrot.slane %v537_v12, 4  ;;  %v2352_v59 = vpop.permute.xlu0 %808  ;;  %v1807_v11 = vrot.slane %v1263_v63, 10  ;;  %v1812_v20 = vrot.slane %v2412_v54, 10  ;;  %v2439_v25 = vmul.f32 %v708_v10, %v2056_v0 }
 0x122   : > { %v811_v9 = vrot.slane %v2352_v59, 4  ;;  %v1411_v44 = vstv %s2400_s5  ;;  %v748_v54 = vrot.slane %v2208_v62, 4 }
 0x123   : > { %v539_v53 = vsel %vm283_vm1, %v538_v39, %v537_v12  ;;  %v2364_v21 = vadd.f32 %v538_v39, %v2280_v33  ;;  %v1805_v33 = vrot.slane %v1242_v26, 10  ;;  %v1811_v12 = vrot.slane %v1305_v1, 10 }
 0x124   : > { %v2368_v29 = vadd.f32 %v539_v53, %v498_v13  ;;  %v812_v30 = vsel %vm315_vm0, %v810_v50, %v811_v9  ;;  %v2427_v13 = vmul.f32 %v721_v38, %v2056_v0  ;;  %v1814_v39 = vrot.slane %v2415_v27, 10 }
 0x125   : > { %v2375_v32 = vsel %vm383_vm5, %v2294_v60, %v812_v30  ;;  %v1283_v60 = vstv %s2348_s23  ;;  %v695_v52 = vstv %s2371_s30  ;;  %v1813_v50 = vrot.slane %v2406_v36, 10  ;;  %s1898_s23 = smov 17   ;;  %s184_s30 = scalar_lea.vmem %s2760_s3, %s1834_s22 }
 0x126   : > { %1229 = vrot.lane.b32.xlu2 %v1803_v40, %s1897_s24  ;;  %v1284_v58 = vmul.f32 %v1283_v60, %v2113_v48  ;;  %v1285_v7 = vmul.f32 %v1283_v60, %v2061_v2  ;;  %v2420_v6 = vmul.f32 %v695_v52, %v2056_v0  ;;  %v2430_v2 = vmul.f32 %v708_v10, %v2035_v55 }
 0x127   : > { %1250 = vrot.lane.b32.xlu1 %v1805_v33, %s1897_s24  ;;  %1231 = vrot.lane.b32.xlu0 %v1804_v35, %s1897_s24  ;;  %v2442_v30 = vmul.f32 %v721_v38, %v2035_v55  ;;  %v1385_v40 = vstv %s2397_s4 }
 0x128   : > { %v2382_v37 = vpop.permute.xlu2 %591  ;;  %v1809_v48 = vrot.slane %v1284_v58, 10  ;;  %v1810_v19 = vrot.slane %v1285_v7, 10  ;;  %v747_v7 = vrot.slane %v2178_v18, 4 }
 0x129   : > { %v2391_v57 = vpop.permute.xlu1 %633  ;;  %v2393_v46 = vpop.permute.xlu0 %622  ;;  %v593_v33 = vrot.slane %v2382_v37, 4 }
 0x12a   : > { %v635_v60 = vrot.slane %v2391_v57, 4 }
 0x12e   : > { %1252 = vrot.lane.b32.xlu2 %v1806_v28, %s1897_s24 }
 0x12f   : > { %1273 = vrot.lane.b32.xlu1 %v1808_v5, %s1897_s24  ;;  %1271 = vrot.lane.b32.xlu0 %v1807_v11, %s1897_s24  ;;  %s2446_s24 = sld [smem:[#allocation3 + $0x4c]]  ;;  %v594_v5 = vsel %vm283_vm1, %v593_v33, %v2382_v37  ;;  %v769_v37 = vrot.slane %v2187_v31, 4 }
 0x130   : > { %v2422_v4 = vpop.permute.xlu2 %665 }
 0x131   : > { %v559_v9 = vpop.permute.xlu1 %558  ;;  %v548_v53 = vpop.permute.xlu0 %547 }
 0x132   : > { %v560_v35 = vrot.slane %v559_v9, 4  ;;  %v549_v41 = vrot.slane %v548_v53, 4 }
 0x134   : > { %v561_v63 = vsel %vm283_vm1, %v560_v35, %v559_v9  ;;  %v565_v28 = vadd.f32 %v560_v35, %v2257_v14  ;;  %v550_v58 = vsel %vm283_vm1, %v549_v41, %v548_v53  ;;  %v554_v1 = vadd.f32 %v549_v41, %v2286_v43 }
 0x135   : > { %v564_v38 = vadd.f32 %v561_v63, %v2344_v8  ;;  %v553_v10 = vadd.f32 %v550_v58, %v2324_v51  ;;  %v697_v43 = vmul.f32 %v695_v52, %v2035_v55  ;;  %v2474_v53 = vmul.f32 %v1385_v40, %v2145_v34 }
 0x136   : > { %1292 = vrot.lane.b32.xlu2 %v1809_v48, %s1896_s10  ;;  %v598_v11 = vadd.f32 %v593_v33, %v554_v1  ;;  %v2477_v51 = vmul.f32 %v1411_v44, %v2145_v34  ;;  %v636_v33 = vsel %vm283_vm1, %v635_v60, %v2391_v57  ;;  %v1346_v35 = vstv %s2435_s7 }
 0x137   : > { %v597_v48 = vadd.f32 %v594_v5, %v553_v10  ;;  %1313 = vrot.lane.b32.xlu1 %v1811_v12, %s1896_s10  ;;  %1294 = vrot.lane.b32.xlu0 %v1810_v19, %s1896_s10  ;;  %v768_v12 = vrot.slane %v2206_v61, 4  ;;  %v749_v19 = vsel %vm315_vm0, %v747_v7, %v748_v54  ;;  %v646_v41 = vrot.slane %v2316_v42, 4 }
 0x138   : > { %v2466_v14 = vpop.permute.xlu2 %869  ;;  %v640_v52 = vadd.f32 %v635_v60, %v598_v11  ;;  %v790_v44 = vrot.slane %v2219_v16, 4  ;;  %v624_v1 = vrot.slane %v2393_v46, 4  ;;  %v667_v57 = vrot.slane %v2422_v4, 4 }
 0x139   : > { %v581_v40 = vpop.permute.xlu1 %580  ;;  %v603_v63 = vpop.permute.xlu0 %602  ;;  %v639_v58 = vadd.f32 %v636_v33, %v597_v48  ;;  %v1347_v60 = vmul.f32 %v1346_v35, %v1972_v22  ;;  %v1372_v11 = vstv %s2446_s24  ;;  %v1359_v9 = vstv %s2452_s8 }
 0x13a   : > { %v582_v10 = vrot.slane %v581_v40, 4  ;;  %v604_v5 = vrot.slane %v603_v63, 4  ;;  %v789_v48 = vrot.slane %v2221_v17, 4  ;;  %v647_v33 = vsel %vm283_vm1, %v646_v41, %v2316_v42 }
 0x13b   : > { %v625_v35 = vsel %vm283_vm1, %v624_v1, %v2393_v46  ;;  %v668_v46 = vsel %vm283_vm1, %v667_v57, %v2422_v4  ;;  %v770_v27 = vsel %vm315_vm0, %v768_v12, %v769_v37  ;;  %v750_v36 = vsel %vm317_vm3, %v2178_v18, %v749_v19 }
 0x13c   : > { %v583_v45 = vsel %vm283_vm1, %v582_v10, %v581_v40  ;;  %v587_v7 = vadd.f32 %v582_v10, %v2364_v21  ;;  %v605_v54 = vsel %vm283_vm1, %v604_v5, %v603_v63  ;;  %v609_v8 = vadd.f32 %v604_v5, %v565_v28 }
 0x13d   : > { %v586_v47 = vadd.f32 %v583_v45, %v2368_v29  ;;  %v608_v26 = vadd.f32 %v605_v54, %v564_v38  ;;  %v1373_v28 = vmul.f32 %v1372_v11, %v1972_v22  ;;  %v1360_v29 = vmul.f32 %v1359_v9, %v1972_v22 }
 0x13e   : > { %1315 = vrot.lane.b32.xlu2 %v1812_v20, %s1896_s10  ;;  %v629_v40 = vadd.f32 %v624_v1, %v587_v7  ;;  %v651_v21 = vadd.f32 %v646_v41, %v609_v8  ;;  %v1753_v20 = vrot.slane %v697_v43, 9  ;;  %v1815_v38 = vrot.slane %v1347_v60, 10 }
 0x13f   : > { %v628_v63 = vadd.f32 %v625_v35, %v586_v47  ;;  %1336 = vrot.lane.b32.xlu1 %v1814_v39, %s1896_s10  ;;  %1334 = vrot.lane.b32.xlu0 %v1813_v50, %s1896_s10  ;;  %v650_v42 = vadd.f32 %v647_v33, %v608_v26  ;;  %v2761_v47 = vstv %s2408_s6  ;;  %v791_v39 = vsel %vm315_vm0, %v789_v48, %v790_v44  ;;  %s2532_s10 = sld [smem:[#allocation3 + $0x4e]] }
 0x140   : > { %v2502_v49 = vpop.permute.xlu2 %892  ;;  %v672_v45 = vadd.f32 %v667_v57, %v629_v40  ;;  %v2519_v8 = vmul.f32 %v2761_v47, %v2145_v34  ;;  %v831_v9 = vrot.slane %v2360_v23, 4  ;;  %v832_v1 = vrot.slane %v2265_v15, 4 }
 0x141   : > { %v671_v22 = vadd.f32 %v668_v46, %v628_v63  ;;  %v688_v50 = vpop.permute.xlu1 %687  ;;  %v677_v26 = vpop.permute.xlu0 %676  ;;  %v2762_v34 = vrot.slane %v2420_v6, 9  ;;  %v1817_v5 = vrot.slane %v1373_v28, 10  ;;  %v1816_v37 = vrot.slane %v1360_v29, 10 }
 0x142   : > { %v689_v43 = vrot.slane %v688_v50, 4  ;;  %v678_v4 = vrot.slane %v677_v26, 4  ;;  %v707_v41 = vadd.f32 %v1753_v20, %v672_v45  ;;  %v771_v6 = vsel %vm317_vm3, %v2206_v61, %v770_v27 }
 0x143   : > { %v706_v10 = vadd.f32 %v2762_v34, %v671_v22  ;;  %v833_v54 = vsel %vm315_vm0, %v831_v9, %v832_v1  ;;  %v2763_v48 = vrot.slane %v2430_v2, 9  ;;  %v1424_v2 = vstv %s2512_s9 }
 0x144   : > { %v690_v12 = vsel %vm283_vm1, %v689_v43, %v688_v50  ;;  %v694_v18 = vadd.f32 %v689_v43, %v651_v21  ;;  %v679_v19 = vsel %vm283_vm1, %v678_v4, %v677_v26  ;;  %v683_v44 = vadd.f32 %v678_v4, %v640_v52 }
 0x145   : > { %v753_v57 = vadd.f32 %v750_v36, %v706_v10  ;;  %v693_v60 = vadd.f32 %v690_v12, %v650_v42  ;;  %v682_v11 = vadd.f32 %v679_v19, %v639_v58  ;;  %v754_v7 = vadd.f32 %v2208_v62, %v707_v41 }
 0x146   : > { %1351 = vrot.lane.b32.xlu2 %v1815_v38, %s1894_s28  ;;  %v720_v33 = vadd.f32 %v2763_v48, %v683_v44  ;;  %v2764_v52 = vrot.slane %v2442_v30, 9  ;;  %v2765_v21 = vrot.slane %v2427_v13, 9  ;;  %v2766_v62 = vrot.slane %v2439_v25, 9 }
 0x147   : > { %1377 = vrot.lane.b32.xlu1 %v1817_v5, %s1894_s28  ;;  %1364 = vrot.lane.b32.xlu0 %v1816_v37, %s1894_s28  ;;  %v817_v61 = vadd.f32 %v2352_v59, %v754_v7  ;;  %v792_v63 = vsel %vm317_vm3, %v2221_v17, %v791_v39  ;;  %v816_v13 = vadd.f32 %v2375_v32, %v753_v57  ;;  %v1818_v59 = vrot.slane %v2474_v53, 10 }
 0x148   : > { %v2540_v35 = vpop.permute.xlu2 %928  ;;  %v733_v40 = vadd.f32 %v2764_v52, %v694_v18  ;;  %v732_v58 = vadd.f32 %v2765_v21, %v693_v60  ;;  %v719_v28 = vadd.f32 %v2766_v62, %v682_v11  ;;  %v775_v30 = vadd.f32 %v2187_v31, %v720_v33 }
 0x149   : > { %v834_v25 = vsel %vm383_vm5, %v2360_v23, %v833_v54  ;;  %v851_v29 = vpop.permute.xlu1 %850  ;;  %v849_v20 = vpop.permute.xlu0 %848  ;;  %v1450_v47 = vstv %s2532_s10  ;;  %v1820_v36 = vrot.slane %v2477_v51, 10  ;;  %v1819_v39 = vrot.slane %v2519_v8, 10 }
 0x14a   : > { %v796_v42 = vadd.f32 %v2219_v16, %v733_v40  ;;  %v795_v46 = vadd.f32 %v792_v63, %v732_v58  ;;  %v774_v45 = vadd.f32 %v771_v6, %v719_v28  ;;  %v853_v38 = vrot.slane %v851_v29, 4 }
 0x14b   : > { %v852_v31 = vrot.slane %v849_v20, 4  ;;  %v838_v16 = vadd.f32 %v2265_v15, %v775_v30  ;;  %v1425_v15 = vmul.f32 %v1424_v2, %v2156_v56  ;;  %v1437_v26 = vstv %s2544_s11 }
 0x14c   : > { %v2564_v17 = vadd.f32 %v851_v29, %v796_v42  ;;  %v837_v32 = vadd.f32 %v834_v25, %v774_v45  ;;  %v1451_v9 = vmul.f32 %v1450_v47, %v2156_v56  ;;  %v930_v43 = vrot.slane %v2540_v35, 4 }
 0x14d   : > { %v854_v23 = vsel %vm315_vm0, %v852_v31, %v853_v38  ;;  %v2575_v53 = vadd.f32 %v2502_v49, %v838_v16  ;;  %v1463_v4 = vstv %s2559_s14  ;;  %v873_v51 = vrot.slane %v2466_v14, 4 }
 0x14e   : > { %1390 = vrot.lane.b32.xlu2 %v1818_v59, %s1894_s28  ;;  %v855_v27 = vsel %vm383_vm5, %v849_v20, %v854_v23  ;;  %v1821_v1 = vrot.slane %v1425_v15, 10  ;;  %v1438_v34 = vmul.f32 %v1437_v26, %v2156_v56  ;;  %v895_v10 = vrot.slane %v2502_v49, 4 }
 0x14f   : > { %v858_v22 = vadd.f32 %v855_v27, %v795_v46  ;;  %1416 = vrot.lane.b32.xlu1 %v1820_v36, %s1894_s28  ;;  %1403 = vrot.lane.b32.xlu0 %v1819_v39, %s1894_s28  ;;  %v1823_v18 = vrot.slane %v1451_v9, 10  ;;  %v1464_v19 = vmul.f32 %v1463_v4, %v2136_v24  ;;  %v1489_v44 = vstv %s2566_s15 }
 0x150   : > { %v968_v50 = vpop.permute.xlu2 %967  ;;  %v1476_v57 = vstv %s2569_s16  ;;  %v931_v56 = vsel %vm283_vm1, %v930_v43, %v2540_v35  ;;  %v1822_v48 = vrot.slane %v1438_v34, 10  ;;  %v1490_v62 = vmul.f32 %v1489_v44, %v2136_v24 }
 0x151   : > { %v891_v41 = vpop.permute.xlu1 %890  ;;  %v872_v8 = vpop.permute.xlu0 %871  ;;  %v969_v60 = vrot.slane %v968_v50, 4  ;;  %v1824_v42 = vrot.slane %v1464_v19, 10  ;;  %v1502_v46 = vstv %s2593_s17  ;;  %v1528_v47 = vstv %s2603_s18 }
 0x152   : > { %v894_v5 = vrot.slane %v891_v41, 4  ;;  %v874_v37 = vrot.slane %v872_v8, 4  ;;  %v880_v12 = vadd.f32 %v872_v8, %v817_v61  ;;  %v1826_v38 = vrot.slane %v1490_v62, 10 }
 0x153   : > { %v970_v28 = vsel %vm283_vm1, %v969_v60, %v968_v50  ;;  %v1503_v23 = vmul.f32 %v1502_v46, %v2167_v3  ;;  %v1515_v27 = vstv %s2605_s19  ;;  %v1118_v36 = vstv %s2611_s20 }
 0x154   : > { %v896_v11 = vsel %vm315_vm0, %v894_v5, %v895_v10  ;;  %v875_v7 = vsel %vm315_vm0, %v873_v51, %v874_v37  ;;  %v935_v6 = vadd.f32 %v930_v43, %v880_v12  ;;  %v1529_v9 = vmul.f32 %v1528_v47, %v2167_v3 }
 0x155   : > { %v897_v49 = vsel %vm443_vm4, %v891_v41, %v896_v11  ;;  %v876_v54 = vsel %vm443_vm4, %v2466_v14, %v875_v7  ;;  %v1477_v14 = vmul.f32 %v1476_v57, %v2136_v24  ;;  %v1827_v41 = vrot.slane %v1503_v23, 10 }
 0x156   : > { %1429 = vrot.lane.b32.xlu2 %v1821_v1, %s1894_s28  ;;  %v900_v33 = vadd.f32 %v897_v49, %v837_v32  ;;  %v879_v40 = vadd.f32 %v876_v54, %v816_v13  ;;  %v974_v21 = vadd.f32 %v969_v60, %v935_v6  ;;  %v1120_v8 = vmul.f32 %v1118_v36, %v2035_v55 }
 0x157   : > { %1455 = vrot.lane.b32.xlu1 %v1823_v18, %s1894_s28  ;;  %1442 = vrot.lane.b32.xlu0 %v1822_v48, %s1894_s28  ;;  %v1825_v31 = vrot.slane %v1477_v14, 10  ;;  %v1829_v18 = vrot.slane %v1529_v9, 10  ;;  %v1119_v44 = vmul.f32 %v1118_v36, %v2056_v0 }
 0x158   : > { %v1007_v52 = vpop.permute.xlu2 %1006  ;;  %v934_v58 = vadd.f32 %v931_v56, %v879_v40 }
 0x159   : > { %v1008_v35 = vrot.slane %v1007_v52, 4  ;;  %v914_v63 = vpop.permute.xlu1 %913  ;;  %v912_v30 = vpop.permute.xlu0 %911  ;;  %v1791_v49 = vrot.slane %v1119_v44, 10 }
 0x15a   : > { %v973_v13 = vadd.f32 %v970_v28, %v934_v58  ;;  %v916_v25 = vrot.slane %v914_v63, 4  ;;  %v922_v29 = vadd.f32 %v914_v63, %v2564_v17  ;;  %v915_v20 = vrot.slane %v912_v30, 4 }
 0x15b   : > { %v1009_v61 = vsel %vm283_vm1, %v1008_v35, %v1007_v52  ;;  %v1013_v2 = vadd.f32 %v1008_v35, %v974_v21 }
 0x15c   : > { %v1012_v24 = vadd.f32 %v1009_v61, %v973_v13  ;;  %v917_v59 = vsel %vm315_vm0, %v915_v20, %v916_v25 }
 0x15d   : > { %v918_v45 = vsel %vm443_vm4, %v912_v30, %v917_v59 }
 0x15e   : > { %1468 = vrot.lane.b32.xlu2 %v1824_v42, %s1894_s28  ;;  %v921_v16 = vadd.f32 %v918_v45, %v858_v22  ;;  %v1516_v22 = vmul.f32 %v1515_v27, %v2167_v3 }
 0x15f   : > { %1494 = vrot.lane.b32.xlu1 %v1826_v38, %s1894_s28  ;;  %1481 = vrot.lane.b32.xlu0 %v1825_v31, %s1894_s28 }
 0x160   : > { %v1046_v32 = vpop.permute.xlu2 %1045  ;;  %v1828_v19 = vrot.slane %v1516_v22, 10 }
 0x161   : > { %v1047_v17 = vrot.slane %v1046_v32, 4  ;;  %v955_v50 = vpop.permute.xlu1 %954  ;;  %v942_v26 = vpop.permute.xlu0 %941 }
 0x162   : > { %v956_v4 = vrot.slane %v955_v50, 4  ;;  %v943_v51 = vrot.slane %v942_v26, 4 }
 0x163   : > { %v1048_v39 = vsel %vm283_vm1, %v1047_v17, %v1046_v32  ;;  %v1052_v15 = vadd.f32 %v1047_v17, %v1013_v2  ;;  %v1144_v32 = vstv %s1742_s21 }
 0x164   : > { %v1051_v43 = vadd.f32 %v1048_v39, %v1012_v24  ;;  %v957_v1 = vsel %vm283_vm1, %v956_v4, %v955_v50  ;;  %v961_v34 = vadd.f32 %v956_v4, %v922_v29  ;;  %v944_v10 = vsel %vm283_vm1, %v943_v51, %v942_v26 }
 0x165   : > { %v948_v5 = vadd.f32 %v943_v51, %v2575_v53  ;;  %v960_v37 = vadd.f32 %v957_v1, %v921_v16  ;;  %v947_v12 = vadd.f32 %v944_v10, %v900_v33  ;;  %v1792_v53 = vrot.slane %v1120_v8, 10 }
 0x166   : > { %1507 = vrot.lane.b32.xlu2 %v1827_v41, %s1894_s28  ;;  %v1146_v26 = vmul.f32 %v1144_v32, %v2035_v55  ;;  %v1145_v4 = vmul.f32 %v1144_v32, %v2056_v0 }
 0x167   : > { %1533 = vrot.lane.b32.xlu1 %v1829_v18, %s1894_s28  ;;  %1520 = vrot.lane.b32.xlu0 %v1828_v19, %s1894_s28  ;;  %s1715_s28 = sld [smem:[#allocation3 + $0x2d]] }
 0x168   : > { %v1085_v3 = vpop.permute.xlu2 %1084  ;;  %v1796_v1 = vrot.slane %v1146_v26, 10 }
 0x169   : > { %v1086_v57 = vrot.slane %v1085_v3, 4  ;;  %v994_v7 = vpop.permute.xlu1 %993  ;;  %v981_v6 = vpop.permute.xlu0 %980 }
 0x16a   : > { %v995_v54 = vrot.slane %v994_v7, 4  ;;  %v982_v48 = vrot.slane %v981_v6, 4 }
 0x16b   : > { %v1087_v60 = vsel %vm283_vm1, %v1086_v57, %v1085_v3  ;;  %v1091_v11 = vadd.f32 %v1086_v57, %v1052_v15 }
 0x16c   : > { %v1090_v56 = vadd.f32 %v1087_v60, %v1051_v43  ;;  %v996_v40 = vsel %vm283_vm1, %v995_v54, %v994_v7  ;;  %v1000_v21 = vadd.f32 %v995_v54, %v961_v34  ;;  %v983_v35 = vsel %vm283_vm1, %v982_v48, %v981_v6 }
 0x16d   : > { %v2638_v33 = vadd.f32 %v1792_v53, %v1091_v11  ;;  %v999_v58 = vadd.f32 %v996_v40, %v960_v37  ;;  %v986_v62 = vadd.f32 %v983_v35, %v947_v12  ;;  %v987_v14 = vadd.f32 %v982_v48, %v948_v5 }
 0x16e   : > { %v2640_v52 = vadd.f32 %v1791_v49, %v1090_v56  ;;  %v1131_v16 = vstv %s1715_s28 }
 0x16f   : > { %v1133_v50 = vmul.f32 %v1131_v16, %v2035_v55  ;;  %v1132_v43 = vmul.f32 %v1131_v16, %v2056_v0  ;;  %v1795_v55 = vrot.slane %v1145_v4, 10 }
 0x170   : > { %v1167_v28 = vpop.permute.xlu2 %1166 }
 0x171   : > { %v1033_v61 = vpop.permute.xlu1 %1032  ;;  %v1020_v2 = vpop.permute.xlu0 %1019  ;;  %v1794_v8 = vrot.slane %v1133_v50, 10  ;;  %v1793_v19 = vrot.slane %v1132_v43, 10  ;;  %v1170_v11 = vrot.slane %v1167_v28, 4 }
 0x172   : > { %v1034_v63 = vrot.slane %v1033_v61, 4  ;;  %v1021_v30 = vrot.slane %v1020_v2, 4 }
 0x174   : > { %v1035_v42 = vsel %vm283_vm1, %v1034_v63, %v1033_v61  ;;  %v1039_v13 = vadd.f32 %v1034_v63, %v1000_v21  ;;  %v1022_v25 = vsel %vm283_vm1, %v1021_v30, %v1020_v2  ;;  %v1026_v29 = vadd.f32 %v1021_v30, %v987_v14 }
 0x175   : > { %v1038_v20 = vadd.f32 %v1035_v42, %v999_v58  ;;  %v1025_v46 = vadd.f32 %v1022_v25, %v986_v62 }
 0x178   : > { %v1190_v24 = vpop.permute.xlu2 %1189 }
 0x179   : > { %v1072_v59 = vpop.permute.xlu1 %1071  ;;  %v1059_v45 = vpop.permute.xlu0 %1058  ;;  %v1192_v7 = vrot.slane %v1190_v24, 4 }
 0x17a   : > { %v1073_v38 = vrot.slane %v1072_v59, 4  ;;  %v1060_v31 = vrot.slane %v1059_v45, 4 }
 0x17c   : > { %v1074_v23 = vsel %vm283_vm1, %v1073_v38, %v1072_v59  ;;  %v1078_v47 = vadd.f32 %v1073_v38, %v1039_v13  ;;  %v1061_v27 = vsel %vm283_vm1, %v1060_v31, %v1059_v45  ;;  %v1065_v17 = vadd.f32 %v1060_v31, %v1026_v29 }
 0x17d   : > { %v1077_v36 = vadd.f32 %v1074_v23, %v1038_v20  ;;  %v1064_v39 = vadd.f32 %v1061_v27, %v1025_v46 }
 0x180   : > { %v1230_v15 = vpop.permute.xlu2 %1229 }
 0x181   : > { %v1111_v9 = vpop.permute.xlu1 %1110  ;;  %v1098_v22 = vpop.permute.xlu0 %1097  ;;  %v1233_v31 = vrot.slane %v1230_v15, 4 }
 0x182   : > { %v1112_v51 = vrot.slane %v1111_v9, 4  ;;  %v1099_v41 = vrot.slane %v1098_v22, 4 }
 0x184   : > { %v1113_v34 = vsel %vm283_vm1, %v1112_v51, %v1111_v9  ;;  %v1117_v10 = vadd.f32 %v1112_v51, %v1078_v47  ;;  %v1100_v5 = vsel %vm283_vm1, %v1099_v41, %v1098_v22  ;;  %v1104_v37 = vadd.f32 %v1099_v41, %v1065_v17 }
 0x185   : > { %v1116_v12 = vadd.f32 %v1113_v34, %v1077_v36  ;;  %v1103_v18 = vadd.f32 %v1100_v5, %v1064_v39 }
 0x186   : > { %v1143_v44 = vadd.f32 %v1794_v8, %v1104_v37  ;;  %v2654_v57 = vadd.f32 %v1796_v1, %v1117_v10 }
 0x187   : > { %v1142_v60 = vadd.f32 %v1793_v19, %v1103_v18  ;;  %v2656_v0 = vadd.f32 %v1795_v55, %v1116_v12 }
 0x188   : > { %v1253_v3 = vpop.permute.xlu2 %1252  ;;  %v1198_v6 = vadd.f32 %v1190_v24, %v1143_v44 }
 0x189   : > { %v1188_v53 = vpop.permute.xlu1 %1187  ;;  %v1169_v56 = vpop.permute.xlu0 %1168  ;;  %v1255_v25 = vrot.slane %v1253_v3, 4 }
 0x18a   : > { %v2658_v49 = vadd.f32 %v1253_v3, %v1198_v6  ;;  %v1191_v54 = vrot.slane %v1188_v53, 4  ;;  %v1171_v48 = vrot.slane %v1169_v56, 4  ;;  %v1177_v50 = vadd.f32 %v1169_v56, %v2638_v33 }
 0x18c   : > { %v1193_v40 = vsel %vm315_vm0, %v1191_v54, %v1192_v7  ;;  %v1172_v21 = vsel %vm315_vm0, %v1170_v11, %v1171_v48 }
 0x18d   : > { %v1194_v35 = vsel %vm317_vm3, %v1188_v53, %v1193_v40  ;;  %v1173_v58 = vsel %vm317_vm3, %v1167_v28, %v1172_v21 }
 0x18e   : > { %v1197_v62 = vadd.f32 %v1194_v35, %v1142_v60  ;;  %v1176_v14 = vadd.f32 %v1173_v58, %v2640_v52 }
 0x190   : > { %v1293_v61 = vpop.permute.xlu2 %1292 }
 0x191   : > { %v2665_v2 = vpop.permute.xlu1 %1210  ;;  %v2667_v63 = vpop.permute.xlu0 %1208  ;;  %v1296_v23 = vrot.slane %v1293_v61, 4 }
 0x198   : > { %v2669_v30 = vpop.permute.xlu2 %1315 }
 0x199   : > { %v1251_v42 = vpop.permute.xlu1 %1250  ;;  %v1232_v13 = vpop.permute.xlu0 %1231 }
 0x19a   : > { %v1254_v29 = vrot.slane %v1251_v42, 4  ;;  %v1234_v45 = vrot.slane %v1232_v13, 4  ;;  %v1240_v22 = vadd.f32 %v1232_v13, %v1177_v50  ;;  %v1212_v13 = vrot.slane %v2667_v63, 4 }
 0x19c   : > { %v1256_v20 = vsel %vm315_vm0, %v1254_v29, %v1255_v25  ;;  %v1235_v47 = vsel %vm315_vm0, %v1233_v31, %v1234_v45 }
 0x19d   : > { %v1257_v46 = vsel %vm383_vm5, %v1251_v42, %v1256_v20  ;;  %v1236_v36 = vsel %vm383_vm5, %v1230_v15, %v1235_v47  ;;  %v1213_v42 = vrot.slane %v2665_v2, 4 }
 0x19e   : > { %v2673_v24 = vadd.f32 %v1257_v46, %v1197_v62  ;;  %v1239_v9 = vadd.f32 %v1236_v36, %v1176_v14 }
 0x19f   : > { %v1214_v45 = vsel %vm315_vm0, %v1212_v13, %v1213_v42 }
 0x1a0   : > { %v1352_v28 = vpop.permute.xlu2 %1351  ;;  %v1215_v36 = vsel %vm317_vm3, %v2667_v63, %v1214_v45 }
 0x1a1   : > { %v2675_v59 = vpop.permute.xlu1 %1273  ;;  %v2677_v52 = vpop.permute.xlu0 %1271  ;;  %v1353_v43 = vrot.slane %v1352_v28, 4 }
 0x1a2   : > { %v1276_v20 = vrot.slane %v2675_v59, 4  ;;  %v1275_v46 = vrot.slane %v2677_v52, 4 }
 0x1a3   : > { %v1354_v8 = vsel %vm283_vm1, %v1353_v43, %v1352_v28 }
 0x1a8   : > { %v1391_v38 = vpop.permute.xlu2 %1390 }
 0x1a9   : > { %v2679_v16 = vpop.permute.xlu1 %1313  ;;  %v1295_v32 = vpop.permute.xlu0 %1294  ;;  %v1392_v34 = vrot.slane %v1391_v38, 4 }
 0x1aa   : > { %v1297_v27 = vrot.slane %v1295_v32, 4  ;;  %v1303_v1 = vadd.f32 %v1295_v32, %v1240_v22 }
 0x1ab   : > { %v1393_v12 = vsel %vm283_vm1, %v1392_v34, %v1391_v38  ;;  %v1317_v38 = vrot.slane %v2679_v16, 4 }
 0x1ac   : > { %v1298_v17 = vsel %vm315_vm0, %v1296_v23, %v1297_v27  ;;  %v1358_v37 = vadd.f32 %v1353_v43, %v1303_v1  ;;  %v1318_v27 = vrot.slane %v2669_v30, 4 }
 0x1ad   : > { %v1299_v26 = vsel %vm443_vm4, %v1293_v61, %v1298_v17  ;;  %v1277_v17 = vsel %vm315_vm0, %v1275_v46, %v1276_v20 }
 0x1ae   : > { %v1302_v41 = vadd.f32 %v1299_v26, %v1239_v9  ;;  %v1397_v3 = vadd.f32 %v1392_v34, %v1358_v37  ;;  %v1319_v50 = vsel %vm315_vm0, %v1317_v38, %v1318_v27  ;;  %v1278_v9 = vsel %vm383_vm5, %v2677_v52, %v1277_v17 }
 0x1af   : > { %v1320_v63 = vsel %vm443_vm4, %v2679_v16, %v1319_v50  ;;  %v1324_v34 = vadd.f32 %v2669_v30, %v2658_v49 }
 0x1b0   : > { %v1430_v39 = vpop.permute.xlu2 %1429  ;;  %v1357_v10 = vadd.f32 %v1354_v8, %v1302_v41  ;;  %v1218_v41 = vadd.f32 %v1215_v36, %v2656_v0 }
 0x1b1   : > { %v2686_v4 = vpop.permute.xlu1 %1336  ;;  %v1335_v51 = vpop.permute.xlu0 %1334  ;;  %v1431_v15 = vrot.slane %v1430_v39, 4 }
 0x1b2   : > { %v1396_v55 = vadd.f32 %v1393_v12, %v1357_v10  ;;  %v1339_v31 = vrot.slane %v2686_v4, 4  ;;  %v1338_v32 = vrot.slane %v1335_v51, 4  ;;  %v1281_v10 = vadd.f32 %v1278_v9, %v1218_v41 }
 0x1b3   : > { %v1432_v44 = vsel %vm283_vm1, %v1431_v15, %v1430_v39  ;;  %v1436_v60 = vadd.f32 %v1431_v15, %v1397_v3  ;;  %v1219_v39 = vadd.f32 %v2665_v2, %v2654_v57 }
 0x1b4   : > { %v1435_v7 = vadd.f32 %v1432_v44, %v1396_v55  ;;  %v1340_v26 = vsel %vm315_vm0, %v1338_v32, %v1339_v31 }
 0x1b5   : > { %v1282_v8 = vadd.f32 %v2675_v59, %v1219_v39  ;;  %v1341_v57 = vsel %vm443_vm4, %v1335_v51, %v1340_v26  ;;  %v1323_v51 = vadd.f32 %v1320_v63, %v2673_v24 }
 0x1b6   : > { %v1344_v12 = vadd.f32 %v1341_v57, %v1281_v10 }
 0x1b7   : > { %v1345_v52 = vadd.f32 %v2686_v4, %v1282_v8 }
 0x1b8   : > { %v1469_v5 = vpop.permute.xlu2 %1468 }
 0x1b9   : > { %v1470_v33 = vrot.slane %v1469_v5, 4  ;;  %v2690_v18 = vpop.permute.xlu1 %1377  ;;  %v2692_v19 = vpop.permute.xlu0 %1364 }
 0x1ba   : > { %v1379_v22 = vrot.slane %v2690_v18, 4  ;;  %v1366_v43 = vrot.slane %v2692_v19, 4 }
 0x1bb   : > { %v1471_v11 = vsel %vm283_vm1, %v1470_v33, %v1469_v5  ;;  %v1475_v53 = vadd.f32 %v1470_v33, %v1436_v60 }
 0x1bc   : > { %v1474_v54 = vadd.f32 %v1471_v11, %v1435_v7  ;;  %v1380_v0 = vsel %vm283_vm1, %v1379_v22, %v2690_v18  ;;  %v1367_v59 = vsel %vm283_vm1, %v1366_v43, %v2692_v19  ;;  %v1384_v33 = vadd.f32 %v1379_v22, %v1345_v52 }
 0x1bd   : > { %v1371_v55 = vadd.f32 %v1366_v43, %v1324_v34  ;;  %v1383_v44 = vadd.f32 %v1380_v0, %v1344_v12  ;;  %v1370_v60 = vadd.f32 %v1367_v59, %v1323_v51  ;;  %v1558_v43 = vlaneseq }
 0x1bf   : > { %vm1560_vm10 = vcmp.lt.s32.totalorder %v1558_v43, 256 }
 0x1c0   : > { %v1508_v6 = vpop.permute.xlu2 %1507 }
 0x1c1   : > { %v1509_v56 = vrot.slane %v1508_v6, 4  ;;  %v1417_v21 = vpop.permute.xlu1 %1416  ;;  %v1404_v35 = vpop.permute.xlu0 %1403 }
 0x1c2   : > { %v1418_v2 = vrot.slane %v1417_v21, 4  ;;  %v1405_v1 = vrot.slane %v1404_v35, 4 }
 0x1c3   : > { %v1510_v48 = vsel %vm283_vm1, %v1509_v56, %v1508_v6  ;;  %v1514_v40 = vadd.f32 %v1509_v56, %v1475_v53 }
 0x1c4   : > { %v1513_v58 = vadd.f32 %v1510_v48, %v1474_v54  ;;  %v1419_v49 = vsel %vm283_vm1, %v1418_v2, %v1417_v21  ;;  %v1406_v30 = vsel %vm283_vm1, %v1405_v1, %v1404_v35  ;;  %v1423_v11 = vadd.f32 %v1418_v2, %v1384_v33 }
 0x1c5   : > { %v1544_v62 = vrot.slane %v1514_v40, 6  ;;  %v1545_v14 = vrot.slane %v1514_v40, 1  ;;  %v1410_v18 = vadd.f32 %v1405_v1, %v1371_v55  ;;  %v1422_v6 = vadd.f32 %v1419_v49, %v1383_v44 }
 0x1c6   : > { %v1543_v61 = vrot.slane %v1513_v58, 3  ;;  %v1409_v53 = vadd.f32 %v1406_v30, %v1370_v60 }
 0x1c7   : > { %v1549_v25 = vsel %vm1548_vm6, %v1544_v62, %v1545_v14 }
 0x1c8   : > { %v1547_v29 = vsel %vm1546_vm7, %v1513_v58, %v1543_v61 }
 0x1c9   : > { %v1551_v28 = vsel %vm1550_vm8, %v1547_v29, %v1549_v25  ;;  %v1456_v23 = vpop.permute.xlu1 %1455  ;;  %v1443_v47 = vpop.permute.xlu0 %1442 }
 0x1ca   : > { %1552 = vrot.lane.b32.xlu2 %v1551_v28, %s1898_s23  ;;  %v1457_v15 = vrot.slane %v1456_v23, 4  ;;  %v1444_v16 = vrot.slane %v1443_v47, 4 }
 0x1cc   : > { %v1458_v7 = vsel %vm283_vm1, %v1457_v15, %v1456_v23  ;;  %v1445_v19 = vsel %vm283_vm1, %v1444_v16, %v1443_v47  ;;  %v1462_v24 = vadd.f32 %v1457_v15, %v1423_v11  ;;  %v1449_v56 = vadd.f32 %v1444_v16, %v1410_v18 }
 0x1cd   : > { %v1461_v40 = vadd.f32 %v1458_v7, %v1422_v6  ;;  %v1448_v21 = vadd.f32 %v1445_v19, %v1409_v53 }
 0x1d1   : > { %v1495_v5 = vpop.permute.xlu1 %1494  ;;  %v1482_v37 = vpop.permute.xlu0 %1481 }
 0x1d2   : > { %v1496_v4 = vrot.slane %v1495_v5, 4  ;;  %v1483_v3 = vrot.slane %v1482_v37, 4 }
 0x1d4   : > { %v1497_v54 = vsel %vm283_vm1, %v1496_v4, %v1495_v5  ;;  %v1484_v48 = vsel %vm283_vm1, %v1483_v3, %v1482_v37  ;;  %v1501_v62 = vadd.f32 %v1496_v4, %v1462_v24  ;;  %v1488_v14 = vadd.f32 %v1483_v3, %v1449_v56 }
 0x1d5   : > { %v1500_v13 = vadd.f32 %v1497_v54, %v1461_v40  ;;  %v1487_v25 = vadd.f32 %v1484_v48, %v1448_v21 }
 0x1d9   : > { %v1534_v35 = vpop.permute.xlu1 %1533  ;;  %v1521_v58 = vpop.permute.xlu0 %1520 }
 0x1da   : > { %v1535_v61 = vrot.slane %v1534_v35, 4  ;;  %v1522_v42 = vrot.slane %v1521_v58, 4 }
 0x1dc   : > { %v1536_v29 = vsel %vm283_vm1, %v1535_v61, %v1534_v35  ;;  %v1540_v20 = vadd.f32 %v1535_v61, %v1501_v62  ;;  %v1523_v46 = vsel %vm283_vm1, %v1522_v42, %v1521_v58  ;;  %v1527_v28 = vadd.f32 %v1522_v42, %v1488_v14 }
 0x1dd   : > { %v1539_v45 = vadd.f32 %v1536_v29, %v1500_v13  ;;  %v1526_v38 = vadd.f32 %v1523_v46, %v1487_v25 }
 0x1de   : > { %v1581_v31 = vrot.slane %v1540_v20, 6  ;;  %v1582_v32 = vrot.slane %v1540_v20, 1  ;;  %v1566_v23 = vrot.slane %v1527_v28, 6  ;;  %v1567_v47 = vrot.slane %v1527_v28, 1 }
 0x1df   : > { %v1580_v27 = vrot.slane %v1539_v45, 3  ;;  %v1565_v17 = vrot.slane %v1526_v38, 3 }
 0x1e0   : > { %v1584_v36 = vsel %vm1548_vm6, %v1581_v31, %v1582_v32  ;;  %v1569_v39 = vsel %vm1548_vm6, %v1566_v23, %v1567_v47 }
 0x1e1   : > { %v1583_v50 = vsel %vm1546_vm7, %v1539_v45, %v1580_v27  ;;  %v1568_v26 = vsel %vm1546_vm7, %v1526_v38, %v1565_v17 }
 0x1e2   : > { %v1585_v9 = vsel %vm1550_vm8, %v1583_v50, %v1584_v36  ;;  %v1570_v22 = vsel %vm1550_vm8, %v1568_v26, %v1569_v39 }
 0x1e3   : > { %1586 = vrot.lane.b32.xlu1 %v1585_v9, %s1898_s23  ;;  %1571 = vrot.lane.b32.xlu0 %v1570_v22, %s1898_s23 }
 0x224   : > { %v1553_v41 = vpop.permute.xlu2 %1552 }
 0x225   : > { %v1554_v8 = vrot.slane %v1553_v41, 1 }
 0x227   : > { %v1556_v63 = vsel %vm1555_vm9, %v1553_v41, %v1554_v8 }
 0x228   : > { %1562 = vst.msk [vmem:[%s184_s30] ss:$4 sm:$0x3] %vm1560_vm10, %v1556_v63 }
 0x255   : > { %v1587_v57 = vpop.permute.xlu1 %1586  ;;  %v1572_v2 = vpop.permute.xlu0 %1571 }
 0x256   : > { %v1588_v1 = vrot.slane %v1587_v57, 1  ;;  %v1573_v34 = vrot.slane %v1572_v2, 1 }
 0x258   : > { %v1589_v10 = vsel %vm1555_vm9, %v1587_v57, %v1588_v1  ;;  %v1574_v52 = vsel %vm1555_vm9, %v1572_v2, %v1573_v34 }
 0x259   : > { %1831 = vst.msk [vmem:[%s184_s30 + $0x2] ss:$4 sm:$0x3] %vm1560_vm10, %v1589_v10 }
 0x25a   : > { %1830 = vst.msk [vmem:[%s184_s30 + $0x1] ss:$4 sm:$0x3] %vm1560_vm10, %v1574_v52 }
 0x25b PF: > { %s14_s12 = sadd.s32 1, %s1888_s12  }
 0x25c   : > { %p11_p7 = scmp.ge.s32.totalorder %s14_s12, 4  }
 0x25e   :  { %13 = sbr.rel (!%p11_p7) target bundleno = 1 (0x1), region = 70 }
 0x263   :  { %1614 = vsyncpa [#allocation4], 1 }
 0x264   :  { %1616 = vsyncpa [#allocation4 + $0x1], 1 }

</bundles_post_ra>
